<compile_context>
chip_gen: v7x
topology: tpu7x:2x2x1
jax: 0.10.0
libtpu: 0.0.40
codegen_flags: <defaults>
</compile_context>

<pallas_src>
import functools

import jax
import jax.numpy as jnp
from jax.experimental import pallas as pl
from jax.experimental.pallas import tpu as pltpu


def _round_up(a: int, m: int) -> int:
    return (a + m - 1) // m * m


def _simpo_fwd_kernel(x_ref, w_ref, t_ref, logp_ref, m_sc, s_sc, tl_sc, *,
                      tv: int, sub: int, vocab_size: int):
    """Fused linear + streamed (online) log_softmax + target gather.

    x_ref:    (H_aug, TR) matmul-dtype activations (resident over vocab axis),
              pre-transposed so the dot below is canonical (M,K)x(K,N).
    w_ref:    (TV, H_aug) matmul-dtype lm-head tile (streamed over vocab axis;
              bias folded in as an extra column when present).
    t_ref:    (1, TR)  i32 target ids (lane-dense).
    logp_ref: (1, TR)  f32 out: log p(target) per token (masked in wrapper).
    m_sc/s_sc/tl_sc: (1, TR) f32 scratch — running max / exp-sum / target logit.
    """
    j = pl.program_id(1)
    NEG = jnp.float32(-1e30)          # finite sentinel: avoids inf-inf NaNs

    @pl.when(j == 0)
    def _():
        m_sc[...] = jnp.full_like(m_sc, NEG)
        s_sc[...] = jnp.zeros_like(s_sc)
        tl_sc[...] = jnp.zeros_like(tl_sc)

    x = x_ref[...]                    # (H_aug, TR), resident across vocab steps
    tgt = t_ref[...]                  # (1, TR) int32

    # Short, static sub-block loop (fully unrolled at trace time): keeps the
    # f32 logits + elementwise temporaries bounded to (SUB, TR) per iteration
    # instead of materializing a full (TV, TR) slab that spills to VMEM.
    for c in range(tv // sub):
        w_blk = w_ref[pl.ds(c * sub, sub), :]            # static ref slice
        # (SUB, H_aug) @ (H_aug, TR) -> (SUB, TR); f32 accumulation on the MXU,
        # no operand transpose needed.
        logits = jax.lax.dot_general(
            w_blk, x, (((1,), (0,)), ((), ())),
            preferred_element_type=jnp.float32)

        base = j * tv + c * sub
        vocab_id = jax.lax.broadcasted_iota(jnp.int32, (sub, 1), 0) + base
        in_vocab = vocab_id < vocab_size                 # (SUB, 1)
        hit = vocab_id == tgt                            # (SUB, TR)

        # Fused target-logit extraction (at most one hit per column).
        tl_sc[...] += jnp.sum(jnp.where(hit, logits, 0.0), axis=0,
                              keepdims=True)

        # Online log-sum-exp over the vocab (sublane) axis, padded columns
        # masked out (robust even when a whole sub-block is vocab padding).
        logits_m = jnp.where(in_vocab, logits, NEG)
        m_prev = m_sc[...]
        m_new = jnp.maximum(m_prev, jnp.max(logits_m, axis=0, keepdims=True))
        p = jnp.where(in_vocab, jnp.exp(logits_m - m_new), 0.0)
        s_sc[...] = (s_sc[...] * jnp.exp(m_prev - m_new)
                     + jnp.sum(p, axis=0, keepdims=True))
        m_sc[...] = m_new

    @pl.when(j == pl.num_programs(1) - 1)
    def _():
        # lane-dense (1, TR) store
        logp_ref[...] = tl_sc[...] - (m_sc[...] + jnp.log(s_sc[...]))


def _vmem_limit_bytes_default() -> int:
    """Explicit per-generation scoped-VMEM limit (64 MiB phys on v7x,
    128 MiB on v5e/v6e). Conservative fallback if the query is unavailable."""
    try:
        info = pltpu.get_tpu_info()
        cap = int(getattr(info, "vmem_capacity_bytes", 64 << 20))
    except Exception:  # non-TPU backend / older runtime
        cap = 64 << 20
    return min(int(cap * 0.9), 120 << 20)


def fused_linear_simpo_loss(lin_weight, _input, target, bias=None, *,
                            ignore_index=-100, beta=0.1, alpha=1.0,
                            compute_nll_loss=True, gamma=0.5,
                            rows_per_tile=None, vocab_tile=None,
                            vocab_subtile=256, matmul_dtype=jnp.bfloat16,
                            vmem_limit_bytes=None):
    """Forward pass of LigerFusedLinearSimPOLoss (returns scalar loss).

    rows_per_tile=None / vocab_tile=None derive tiles from the per-generation
    VMEM budget (TR up to 512, multiple of 128/256; TV up to 2048).
    """
    B2, T, H = _input.shape
    V, Hw = lin_weight.shape
    assert Hw == H
    assert B2 % 2 == 0, "batch must contain chosen and rejected halves"
    B = B2 // 2
    N = B2 * T

    # Matmul dtype: bf16 by default — halves the dominant weight-stream bytes
    # and runs at full MXU rate on v5e/v6e/v7x. Softmax math stays f32.
    cdt = jnp.dtype(matmul_dtype) if matmul_dtype is not None else _input.dtype
    itemsize = jnp.dtype(cdt).itemsize

    # --- fold the bias into the matmul ------------------------------------
    x2 = _input.reshape(N, H).astype(cdt)
    w2 = lin_weight.astype(cdt)
    if bias is not None:
        H_aug = _round_up(H + 1, 16)          # keep sublane packing clean
        pad = H_aug - H
        x2 = jnp.concatenate(
            [x2, jnp.ones((N, 1), cdt), jnp.zeros((N, pad - 1), cdt)], axis=1)
        w2 = jnp.concatenate(
            [w2, bias.reshape(V, 1).astype(cdt),
             jnp.zeros((V, pad - 1), cdt)], axis=1)
    else:
        H_aug = H

    # --- per-generation tile derivation -----------------------------------
    if vmem_limit_bytes is None:
        vmem_limit_bytes = _vmem_limit_bytes_default()
    budget = int(vmem_limit_bytes * 0.75)

    sub = max(128, (int(vocab_subtile) // 128) * 128)
    lane_h = _round_up(H_aug, 128)

    if rows_per_tile is None:
        # TR is the arithmetic-intensity lever (weight re-stream ~ 1/TR); aim
        # for 512 (multiple of 256 for the v6e/v7x 256-wide MXU) but never
        # pad tiny batches beyond one 128-aligned tile.
        TR = min(512, _round_up(max(N, 1), 128))
    else:
        TR = _round_up(int(rows_per_tile), 128)
    N_pad = _round_up(N, TR)

    if vocab_tile is None:
        x_tile_bytes = _round_up(H_aug, 16) * TR * itemsize
        w_budget = max(budget - 2 * x_tile_bytes - (4 << 20),
                       2 * sub * lane_h * itemsize)
        TV = w_budget // (2 * lane_h * itemsize)     # double-buffered stream
        TV = max(sub, (int(TV) // sub) * sub)
        TV = min(TV, 2048)
    else:
        TV = max(sub, _round_up(int(vocab_tile), sub))
    TV = min(TV, max(sub, _round_up(V, sub)))        # don't over-pad tiny V
    V_pad = _round_up(V, TV)

    # --- host-side layout / padding ----------------------------------------
    if N_pad != N:
        x2 = jnp.pad(x2, ((0, N_pad - N), (0, 0)))
    # Pre-transpose so the kernel dot is (M,K)x(K,N) with no per-step vxpose
    # of the resident activation tile.
    x_t = x2.T                                        # (H_aug, N_pad)

    if V_pad != V:
        w2 = jnp.pad(w2, ((0, V_pad - V), (0, 0)))    # padded rows -> 0 logits

    t_flat = target.reshape(N).astype(jnp.int32)
    if N_pad != N:
        t_flat = jnp.pad(t_flat, (0, N_pad - N), constant_values=ignore_index)
    t2 = t_flat.reshape(1, N_pad)                     # lane-dense targets

    # --- pallas call --------------------------------------------------------
    grid = (N_pad // TR, V_pad // TV)
    kernel = functools.partial(_simpo_fwd_kernel, tv=TV, sub=sub, vocab_size=V)

    cost = pl.CostEstimate(
        flops=int(2 * N_pad * H_aug * V_pad),
        transcendentals=int(N_pad * V_pad),
        bytes_accessed=int((N_pad // TR) * V_pad * H_aug * itemsize  # w stream
                           + N_pad * H_aug * itemsize                # activations
                           + N_pad * 8))                             # tgt + logp

    compiler_params = pltpu.CompilerParams(
        # Row axis "parallel" -> shards across the two v7x TensorCores (no-op
        # on single-TC v5e/v6e); vocab reduction axis stays "arbitrary".
        dimension_semantics=("parallel", "arbitrary"),
        vmem_limit_bytes=int(vmem_limit_bytes))

    logp = pl.pallas_call(
        kernel,
        out_shape=jax.ShapeDtypeStruct((1, N_pad), jnp.float32),
        grid=grid,
        in_specs=[
            pl.BlockSpec((H_aug, TR), lambda i, j: (0, i)),  # x (resident over j)
            pl.BlockSpec((TV, H_aug), lambda i, j: (j, 0)),  # weight (streamed)
            pl.BlockSpec((1, TR), lambda i, j: (0, i)),      # targets
        ],
        out_specs=pl.BlockSpec((1, TR), lambda i, j: (0, i)),
        scratch_shapes=[pltpu.VMEM((1, TR), jnp.float32)] * 3,
        compiler_params=compiler_params,
        cost_estimate=cost,
    )(x_t, w2, t2)

    # --- tiny per-sequence reductions (2B values) stay in JAX glue ----------
    logp = logp.reshape(N_pad)[:N].reshape(B2, T)
    valid = (target != ignore_index).astype(jnp.float32)
    per_tok = logp * valid                            # zero out ignored tokens

    # NOTE: max(.,1) deviates from the reference only for a sequence with zero
    # valid tokens (reference would produce inf/nan there).
    denom = jnp.maximum(valid.sum(-1), 1.0)
    avg_logp = per_tok.sum(-1) / denom                # (2B,)
    chosen_logps = avg_logp[:B]
    rejected_logps = avg_logp[B:]

    pref_logits = beta * (chosen_logps - rejected_logps) - gamma
    alignment_loss = jnp.mean(jax.nn.log_sigmoid(pref_logits))

    if compute_nll_loss:
        chosen_nll = -per_tok[:B].sum() / jnp.maximum(valid[:B].sum(), 1.0)
    else:
        chosen_nll = 0.0

    return chosen_nll - alpha * alignment_loss


def _reference_loss(lin_weight, _input, target, bias, *, ignore_index, beta,
                    alpha, gamma, compute_nll_loss):
    """Pure-JAX reference mirroring the PyTorch semantics (f32 math)."""
    B2, T, H = _input.shape
    B = B2 // 2
    b = 0.0 if bias is None else bias.astype(jnp.float32)
    logits = jnp.einsum("bth,vh->btv", _input.astype(jnp.float32),
                        lin_weight.astype(jnp.float32)) + b
    log_probs = jax.nn.log_softmax(logits, axis=-1)
    valid = target != ignore_index
    safe_t = jnp.where(valid, target, 0)
    per_tok = jnp.take_along_axis(log_probs, safe_t[..., None], axis=-1)[..., 0]
    per_tok = per_tok * valid
    avg_logp = per_tok.sum(-1) / valid.sum(-1)
    pref_logits = beta * (avg_logp[:B] - avg_logp[B:]) - gamma
    align = jnp.mean(jax.nn.log_sigmoid(pref_logits))
    nll = -per_tok[:B].sum() / valid[:B].sum() if compute_nll_loss else 0.0
    return nll - alpha * align


if __name__ == "__main__":
    # Small but non-trivial shapes: exercise row padding (N=192 -> 256),
    # vocab grid tiling, in-kernel sub-block chunking, a fully-padded trailing
    # vocab sub-block, the folded bias, and the auto tile-derivation path.
    B, T, H, V = 2, 48, 128, 384
    ignore_index, beta, alpha, gamma = -100, 0.1, 1.0, 0.5

    key = jax.random.PRNGKey(0)
    k_in, k_w, k_b, k_t = jax.random.split(key, 4)

    _input = jax.random.normal(k_in, (2 * B, T, H), jnp.float32).astype(jnp.bfloat16)
    lin_weight = (jax.random.normal(k_w, (V, H), jnp.float32) * 0.02).astype(jnp.bfloat16)
    bias = jax.random.normal(k_b, (V,), jnp.float32) * 0.01
    target = jax.random.randint(k_t, (2 * B, T), 0, V, jnp.int32)
    # Sprinkle in ignored positions (padding at the end of sequences).
    target = target.at[:, -4:].set(ignore_index)

    ref = _reference_loss(
        lin_weight, _input, target, bias,
        ignore_index=ignore_index, beta=beta, alpha=alpha, gamma=gamma,
        compute_nll_loss=True)
    ref = jax.block_until_ready(ref)

    # Stress config: 2 row tiles, 2 vocab grid steps, 2 sub-blocks per step
    # (the last sub-block is entirely vocab padding).
    loss_small = fused_linear_simpo_loss(
        lin_weight, _input, target, bias,
        ignore_index=ignore_index, beta=beta, alpha=alpha,
        compute_nll_loss=True, gamma=gamma,
        rows_per_tile=128, vocab_tile=256, vocab_subtile=128)

    # Default config: per-generation auto-derived TR/TV and vmem limit.
    loss_auto = fused_linear_simpo_loss(
        lin_weight, _input, target, bias,
        ignore_index=ignore_index, beta=beta, alpha=alpha,
        compute_nll_loss=True, gamma=gamma)

    loss_small, loss_auto = jax.block_until_ready((loss_small, loss_auto))

    assert jnp.allclose(loss_small, ref, rtol=2e-3, atol=2e-3), (loss_small, ref)
    assert jnp.allclose(loss_auto, ref, rtol=2e-3, atol=2e-3), (loss_auto, ref)
    print("KERNEL_OK")
</pallas_src>

<mosaic_0001>
module attributes {stable_mosaic.version = 11 : i64} {
  func.func @_simpo_fwd_kernel(%arg0: i32, %arg1: i32, %arg2: memref<144x128xbf16, #tpu.memory_space<vmem>>, %arg3: memref<256x144xbf16, #tpu.memory_space<vmem>>, %arg4: memref<1x128xi32, #tpu.memory_space<vmem>>, %arg5: memref<1x128xf32, #tpu.memory_space<vmem>>, %arg6: memref<1x128xf32, #tpu.memory_space<vmem>>, %arg7: memref<1x128xf32, #tpu.memory_space<vmem>>, %arg8: memref<1x128xf32, #tpu.memory_space<vmem>>) attributes {dimension_semantics = [#tpu.dimension_semantics<parallel>, #tpu.dimension_semantics<arbitrary>], iteration_bounds = array<i64: 2, 2>, scalar_prefetch = 0 : i64, scratch_operands = 3 : i64, tpu.core_type = #tpu.core_type<tc>, window_params = [{transform_indices = @transform_0, window_bounds = array<i64: 144, 128>}, {transform_indices = @transform_1, window_bounds = array<i64: 256, 144>}, {transform_indices = @transform_2, window_bounds = array<i64: 1, 128>}, {transform_indices = @transform_3, window_bounds = array<i64: 1, 128>}]} {
    %c0_i32 = arith.constant 0 : i32
    %0 = arith.cmpi eq, %arg1, %c0_i32 : i32
    %1 = arith.extui %0 : i1 to i32
    %cst = arith.constant -1.000000e+30 : f32
    %c0_i32_0 = arith.constant 0 : i32
    %2 = arith.cmpi ne, %1, %c0_i32_0 : i32
    scf.if %2 {
      %94 = vector.broadcast %cst : f32 to vector<1x128xf32>
      %c0_49 = arith.constant 0 : index
      %c0_50 = arith.constant 0 : index
      %95 = vector.load %arg6[%c0_49, %c0_50] : memref<1x128xf32, #tpu.memory_space<vmem>>, vector<1x128xf32>
      tpu.vector_store %arg6[%c0_49, %c0_50], %94 {strides = array<i32>} : memref<1x128xf32, #tpu.memory_space<vmem>>, vector<1x128xf32>,
      %cst_51 = arith.constant 0.000000e+00 : f32
      %96 = vector.broadcast %cst_51 : f32 to vector<1x128xf32>
      %c0_52 = arith.constant 0 : index
      %c0_53 = arith.constant 0 : index
      %97 = vector.load %arg7[%c0_52, %c0_53] : memref<1x128xf32, #tpu.memory_space<vmem>>, vector<1x128xf32>
      tpu.vector_store %arg7[%c0_52, %c0_53], %96 {strides = array<i32>} : memref<1x128xf32, #tpu.memory_space<vmem>>, vector<1x128xf32>,
      %cst_54 = arith.constant 0.000000e+00 : f32
      %98 = vector.broadcast %cst_54 : f32 to vector<1x128xf32>
      %c0_55 = arith.constant 0 : index
      %c0_56 = arith.constant 0 : index
      %99 = vector.load %arg8[%c0_55, %c0_56] : memref<1x128xf32, #tpu.memory_space<vmem>>, vector<1x128xf32>
      tpu.vector_store %arg8[%c0_55, %c0_56], %98 {strides = array<i32>} : memref<1x128xf32, #tpu.memory_space<vmem>>, vector<1x128xf32>,
    } else {
    }
    %c0 = arith.constant 0 : index
    %c0_1 = arith.constant 0 : index
    %3 = vector.load %arg2[%c0, %c0_1] : memref<144x128xbf16, #tpu.memory_space<vmem>>, vector<144x128xbf16>
    %c0_2 = arith.constant 0 : index
    %c0_3 = arith.constant 0 : index
    %4 = vector.load %arg4[%c0_2, %c0_3] : memref<1x128xi32, #tpu.memory_space<vmem>>, vector<1x128xi32>
    %c0_4 = arith.constant 0 : index
    %c0_5 = arith.constant 0 : index
    %5 = vector.load %arg3[%c0_4, %c0_5] : memref<256x144xbf16, #tpu.memory_space<vmem>>, vector<128x144xbf16>
    %cst_6 = arith.constant dense<0.000000e+00> : vector<128x128xf32>
    %6 = tpu.matmul %5, %3, %cst_6 {dimension_numbers = #tpu.dot_dimension_numbers<[1], [0], [0], [1], [0, 0, 1, 1], [], []>} : vector<128x144xbf16>, vector<144x128xbf16>, vector<128x128xf32> -> vector<128x128xf32>
    %c256_i32 = arith.constant 256 : i32
    %7 = arith.muli %arg1, %c256_i32 : i32
    %c0_i32_7 = arith.constant 0 : i32
    %8 = arith.addi %7, %c0_i32_7 : i32
    %9 = tpu.iota {dimensions = array<i32: 0>} : vector<128x1xi32>
    %10 = vector.broadcast %8 : i32 to vector<128x1xi32>
    %11 = arith.addi %9, %10 : vector<128x1xi32>
    %c384_i32 = arith.constant 384 : i32
    %12 = vector.broadcast %c384_i32 : i32 to vector<128x1xi32>
    %13 = arith.cmpi slt, %11, %12 : vector<128x1xi32>
    %14 = vector.broadcast %11 : vector<128x1xi32> to vector<128x128xi32>
    %15 = vector.broadcast %4 : vector<1x128xi32> to vector<128x128xi32>
    %16 = arith.cmpi eq, %14, %15 : vector<128x128xi32>
    %c0_8 = arith.constant 0 : index
    %c0_9 = arith.constant 0 : index
    %17 = vector.load %arg8[%c0_8, %c0_9] : memref<1x128xf32, #tpu.memory_space<vmem>>, vector<1x128xf32>
    %cst_10 = arith.constant 0.000000e+00 : f32
    %18 = vector.broadcast %cst_10 : f32 to vector<128x128xf32>
    %19 = arith.select %16, %6, %18 : vector<128x128xi1>, vector<128x128xf32>
    %cst_11 = arith.constant dense<0.000000e+00> : vector<128xf32>
    %20 = vector.multi_reduction <add>, %19, %cst_11 [0] : vector<128x128xf32> to vector<128xf32>
    %21 = vector.shape_cast %20 : vector<128xf32> to vector<1x128xf32>
    %22 = arith.addf %17, %21 : vector<1x128xf32>
    %c0_12 = arith.constant 0 : index
    %c0_13 = arith.constant 0 : index
    %23 = vector.load %arg8[%c0_12, %c0_13] : memref<1x128xf32, #tpu.memory_space<vmem>>, vector<1x128xf32>
    tpu.vector_store %arg8[%c0_12, %c0_13], %22 {strides = array<i32>} : memref<1x128xf32, #tpu.memory_space<vmem>>, vector<1x128xf32>,
    %cst_14 = arith.constant -1.000000e+30 : f32
    %24 = vector.shape_cast %13 : vector<128x1xi1> to vector<128x1xi1>
    %25 = vector.broadcast %24 : vector<128x1xi1> to vector<128x128xi1>
    %26 = vector.broadcast %cst_14 : f32 to vector<128x128xf32>
    %27 = arith.select %25, %6, %26 : vector<128x128xi1>, vector<128x128xf32>
    %c0_15 = arith.constant 0 : index
    %c0_16 = arith.constant 0 : index
    %28 = vector.load %arg6[%c0_15, %c0_16] : memref<1x128xf32, #tpu.memory_space<vmem>>, vector<1x128xf32>
    %cst_17 = arith.constant dense<0xFF800000> : vector<128xf32>
    %29 = vector.multi_reduction <maximumf>, %27, %cst_17 [0] : vector<128x128xf32> to vector<128xf32>
    %30 = vector.shape_cast %29 : vector<128xf32> to vector<1x128xf32>
    %31 = arith.maximumf %28, %30 : vector<1x128xf32>
    %32 = vector.broadcast %31 : vector<1x128xf32> to vector<128x128xf32>
    %33 = arith.subf %27, %32 : vector<128x128xf32>
    %34 = math.exp %33 : vector<128x128xf32>
    %cst_18 = arith.constant 0.000000e+00 : f32
    %35 = vector.shape_cast %13 : vector<128x1xi1> to vector<128x1xi1>
    %36 = vector.broadcast %35 : vector<128x1xi1> to vector<128x128xi1>
    %37 = vector.broadcast %cst_18 : f32 to vector<128x128xf32>
    %38 = arith.select %36, %34, %37 : vector<128x128xi1>, vector<128x128xf32>
    %c0_19 = arith.constant 0 : index
    %c0_20 = arith.constant 0 : index
    %39 = vector.load %arg7[%c0_19, %c0_20] : memref<1x128xf32, #tpu.memory_space<vmem>>, vector<1x128xf32>
    %40 = arith.subf %28, %31 : vector<1x128xf32>
    %41 = math.exp %40 : vector<1x128xf32>
    %42 = arith.mulf %39, %41 : vector<1x128xf32>
    %cst_21 = arith.constant dense<0.000000e+00> : vector<128xf32>
    %43 = vector.multi_reduction <add>, %38, %cst_21 [0] : vector<128x128xf32> to vector<128xf32>
    %44 = vector.shape_cast %43 : vector<128xf32> to vector<1x128xf32>
    %45 = arith.addf %42, %44 : vector<1x128xf32>
    %c0_22 = arith.constant 0 : index
    %c0_23 = arith.constant 0 : index
    %46 = vector.load %arg7[%c0_22, %c0_23] : memref<1x128xf32, #tpu.memory_space<vmem>>, vector<1x128xf32>
    tpu.vector_store %arg7[%c0_22, %c0_23], %45 {strides = array<i32>} : memref<1x128xf32, #tpu.memory_space<vmem>>, vector<1x128xf32>,
    %c0_24 = arith.constant 0 : index
    %c0_25 = arith.constant 0 : index
    %47 = vector.load %arg6[%c0_24, %c0_25] : memref<1x128xf32, #tpu.memory_space<vmem>>, vector<1x128xf32>
    tpu.vector_store %arg6[%c0_24, %c0_25], %31 {strides = array<i32>} : memref<1x128xf32, #tpu.memory_space<vmem>>, vector<1x128xf32>,
    %c128 = arith.constant 128 : index
    %c0_26 = arith.constant 0 : index
    %48 = vector.load %arg3[%c128, %c0_26] : memref<256x144xbf16, #tpu.memory_space<vmem>>, vector<128x144xbf16>
    %cst_27 = arith.constant dense<0.000000e+00> : vector<128x128xf32>
    %49 = tpu.matmul %48, %3, %cst_27 {dimension_numbers = #tpu.dot_dimension_numbers<[1], [0], [0], [1], [0, 0, 1, 1], [], []>} : vector<128x144xbf16>, vector<144x128xbf16>, vector<128x128xf32> -> vector<128x128xf32>
    %c256_i32_28 = arith.constant 256 : i32
    %50 = arith.muli %arg1, %c256_i32_28 : i32
    %c128_i32 = arith.constant 128 : i32
    %51 = arith.addi %50, %c128_i32 : i32
    %52 = tpu.iota {dimensions = array<i32: 0>} : vector<128x1xi32>
    %53 = vector.broadcast %51 : i32 to vector<128x1xi32>
    %54 = arith.addi %52, %53 : vector<128x1xi32>
    %c384_i32_29 = arith.constant 384 : i32
    %55 = vector.broadcast %c384_i32_29 : i32 to vector<128x1xi32>
    %56 = arith.cmpi slt, %54, %55 : vector<128x1xi32>
    %57 = vector.broadcast %54 : vector<128x1xi32> to vector<128x128xi32>
    %58 = vector.broadcast %4 : vector<1x128xi32> to vector<128x128xi32>
    %59 = arith.cmpi eq, %57, %58 : vector<128x128xi32>
    %c0_30 = arith.constant 0 : index
    %c0_31 = arith.constant 0 : index
    %60 = vector.load %arg8[%c0_30, %c0_31] : memref<1x128xf32, #tpu.memory_space<vmem>>, vector<1x128xf32>
    %cst_32 = arith.constant 0.000000e+00 : f32
    %61 = vector.broadcast %cst_32 : f32 to vector<128x128xf32>
    %62 = arith.select %59, %49, %61 : vector<128x128xi1>, vector<128x128xf32>
    %cst_33 = arith.constant dense<0.000000e+00> : vector<128xf32>
    %63 = vector.multi_reduction <add>, %62, %cst_33 [0] : vector<128x128xf32> to vector<128xf32>
    %64 = vector.shape_cast %63 : vector<128xf32> to vector<1x128xf32>
    %65 = arith.addf %60, %64 : vector<1x128xf32>
    %c0_34 = arith.constant 0 : index
    %c0_35 = arith.constant 0 : index
    %66 = vector.load %arg8[%c0_34, %c0_35] : memref<1x128xf32, #tpu.memory_space<vmem>>, vector<1x128xf32>
    tpu.vector_store %arg8[%c0_34, %c0_35], %65 {strides = array<i32>} : memref<1x128xf32, #tpu.memory_space<vmem>>, vector<1x128xf32>,
    %cst_36 = arith.constant -1.000000e+30 : f32
    %67 = vector.shape_cast %56 : vector<128x1xi1> to vector<128x1xi1>
    %68 = vector.broadcast %67 : vector<128x1xi1> to vector<128x128xi1>
    %69 = vector.broadcast %cst_36 : f32 to vector<128x128xf32>
    %70 = arith.select %68, %49, %69 : vector<128x128xi1>, vector<128x128xf32>
    %c0_37 = arith.constant 0 : index
    %c0_38 = arith.constant 0 : index
    %71 = vector.load %arg6[%c0_37, %c0_38] : memref<1x128xf32, #tpu.memory_space<vmem>>, vector<1x128xf32>
    %cst_39 = arith.constant dense<0xFF800000> : vector<128xf32>
    %72 = vector.multi_reduction <maximumf>, %70, %cst_39 [0] : vector<128x128xf32> to vector<128xf32>
    %73 = vector.shape_cast %72 : vector<128xf32> to vector<1x128xf32>
    %74 = arith.maximumf %71, %73 : vector<1x128xf32>
    %75 = vector.broadcast %74 : vector<1x128xf32> to vector<128x128xf32>
    %76 = arith.subf %70, %75 : vector<128x128xf32>
    %77 = math.exp %76 : vector<128x128xf32>
    %cst_40 = arith.constant 0.000000e+00 : f32
    %78 = vector.shape_cast %56 : vector<128x1xi1> to vector<128x1xi1>
    %79 = vector.broadcast %78 : vector<128x1xi1> to vector<128x128xi1>
    %80 = vector.broadcast %cst_40 : f32 to vector<128x128xf32>
    %81 = arith.select %79, %77, %80 : vector<128x128xi1>, vector<128x128xf32>
    %c0_41 = arith.constant 0 : index
    %c0_42 = arith.constant 0 : index
    %82 = vector.load %arg7[%c0_41, %c0_42] : memref<1x128xf32, #tpu.memory_space<vmem>>, vector<1x128xf32>
    %83 = arith.subf %71, %74 : vector<1x128xf32>
    %84 = math.exp %83 : vector<1x128xf32>
    %85 = arith.mulf %82, %84 : vector<1x128xf32>
    %cst_43 = arith.constant dense<0.000000e+00> : vector<128xf32>
    %86 = vector.multi_reduction <add>, %81, %cst_43 [0] : vector<128x128xf32> to vector<128xf32>
    %87 = vector.shape_cast %86 : vector<128xf32> to vector<1x128xf32>
    %88 = arith.addf %85, %87 : vector<1x128xf32>
    %c0_44 = arith.constant 0 : index
    %c0_45 = arith.constant 0 : index
    %89 = vector.load %arg7[%c0_44, %c0_45] : memref<1x128xf32, #tpu.memory_space<vmem>>, vector<1x128xf32>
    tpu.vector_store %arg7[%c0_44, %c0_45], %88 {strides = array<i32>} : memref<1x128xf32, #tpu.memory_space<vmem>>, vector<1x128xf32>,
    %c0_46 = arith.constant 0 : index
    %c0_47 = arith.constant 0 : index
    %90 = vector.load %arg6[%c0_46, %c0_47] : memref<1x128xf32, #tpu.memory_space<vmem>>, vector<1x128xf32>
    tpu.vector_store %arg6[%c0_46, %c0_47], %74 {strides = array<i32>} : memref<1x128xf32, #tpu.memory_space<vmem>>, vector<1x128xf32>,
    %c1_i32 = arith.constant 1 : i32
    %91 = arith.cmpi eq, %arg1, %c1_i32 : i32
    %92 = arith.extui %91 : i1 to i32
    %c0_i32_48 = arith.constant 0 : i32
    %93 = arith.cmpi ne, %92, %c0_i32_48 : i32
    scf.if %93 {
      %c0_49 = arith.constant 0 : index
      %c0_50 = arith.constant 0 : index
      %94 = vector.load %arg8[%c0_49, %c0_50] : memref<1x128xf32, #tpu.memory_space<vmem>>, vector<1x128xf32>
      %c0_51 = arith.constant 0 : index
      %c0_52 = arith.constant 0 : index
      %95 = vector.load %arg6[%c0_51, %c0_52] : memref<1x128xf32, #tpu.memory_space<vmem>>, vector<1x128xf32>
      %c0_53 = arith.constant 0 : index
      %c0_54 = arith.constant 0 : index
      %96 = vector.load %arg7[%c0_53, %c0_54] : memref<1x128xf32, #tpu.memory_space<vmem>>, vector<1x128xf32>
      %97 = math.log %96 : vector<1x128xf32>
      %98 = arith.addf %95, %97 : vector<1x128xf32>
      %99 = arith.subf %94, %98 : vector<1x128xf32>
      %c0_55 = arith.constant 0 : index
      %c0_56 = arith.constant 0 : index
      %100 = vector.load %arg5[%c0_55, %c0_56] : memref<1x128xf32, #tpu.memory_space<vmem>>, vector<1x128xf32>
      tpu.vector_store %arg5[%c0_55, %c0_56], %99 {strides = array<i32>} : memref<1x128xf32, #tpu.memory_space<vmem>>, vector<1x128xf32>,
    } else {
    }
    return
  }
  func.func @transform_0(%arg0: i32, %arg1: i32) -> (i32, i32) {
    %c0_i32 = arith.constant 0 : i32
    %c0_i32_0 = arith.constant 0 : i32
    return %c0_i32, %arg0 : i32, i32
  }
  func.func @transform_1(%arg0: i32, %arg1: i32) -> (i32, i32) {
    %c0_i32 = arith.constant 0 : i32
    %c0_i32_0 = arith.constant 0 : i32
    return %arg1, %c0_i32 : i32, i32
  }
  func.func @transform_2(%arg0: i32, %arg1: i32) -> (i32, i32) {
    %c0_i32 = arith.constant 0 : i32
    %c0_i32_0 = arith.constant 0 : i32
    return %c0_i32, %arg0 : i32, i32
  }
  func.func @transform_3(%arg0: i32, %arg1: i32) -> (i32, i32) {
    %c0_i32 = arith.constant 0 : i32
    %c0_i32_0 = arith.constant 0 : i32
    return %c0_i32, %arg0 : i32, i32
  }
}

</mosaic_0001>

<bundles_post_ra>
// kernel: tpu_custom_call.1
= control target key start
LH: loop header
LB: loop body
LE: loop exit
PB: predicated region body
PF: predicated region fallthrough
CT: control target
= control target key end

     0   :  { %8 = vsyncpa [#allocation7], 0  ;;  %s2748_s0 = inlined_call_operand.vmem [shape: bf16[144,256], index: 0, kind: input, shape index: {}]   ;;  %s2749_s1 = inlined_call_operand.vmem [shape: bf16[512,144], index: 1, kind: input, shape index: {}]   ;;  %s2750_s2 = inlined_call_operand.vmem [shape: s32[1,256], index: 2, kind: input, shape index: {}]   ;;  %s2751_s3 = inlined_call_operand.hbm [shape: f32[1,256], index: 3, kind: output, shape index: {}]  }
   0x1   :  { %10 = vsyncpa [#allocation7 + $0x1], 0  ;;  %s1884_s12 = smov 0   ;;  %s1886_s13 = smov 0  }
   0x2   :  { %s1888_s14 = smov 0   ;;  %s1890_s15 = smov 0  }
   0x3   :  { %s1892_s16 = smov 0   ;;  %s1894_s17 = smov 0  }
   0x4   :  { %s1896_s18 = smov 0   ;;  %s1898_s19 = smov 0  }
   0x5 LB: > { %s1487_s20 = sadd.s32 4294967295, %s1858_s19   ;;  %s1488_s21 = sadd.s32 4294967294, %s1858_s19   ;;  %s1858_s19 = sphi %s1898_s19, %s16_s19   ;;  %s1854_s18 = sphi %s1896_s18, %s2879_s18   ;;  %s1850_s17 = sphi %s1894_s17, %s2878_s17   ;;  %s1846_s16 = sphi %s1892_s16, %s2877_s16   ;;  %s1842_s15 = sphi %s1890_s15, %s2876_s15   ;;  %s1838_s14 = sphi %s1888_s14, %s2875_s14   ;;  %s1834_s13 = sphi %s1886_s13, %s2874_s13   ;;  %s1830_s12 = sphi %s1884_s12, %s2873_s12  }
   0x6   : > { %s25_s22 = sadd.s32 1, %s1850_s17  ;;  %s28_s23 = sadd.s32 1, %s1854_s18 }
   0x7   : > { %p26_p0 = scmp.ge.s32.totalorder %s25_s22, 2  ;;  %p42_p1 = scmp.ne.s32.totalorder %s1838_s14, %s1834_s13 }
   0x8   : > { %p43_p2 = scmp.eq.s32.totalorder %s1858_s19, 0  ;;  %p124_p4 = scmp.eq.s32.totalorder %s1487_s20, 3 }
   0x9   : > { %s2881_s22 = smov (%p26_p0, %s25_s22), 0  ;;  %s2883_s23 = smov (!%p26_p0, %s28_s23), %s1854_s18 }
   0xa   : > { %p1934_p3 = por %p43_p2, %p42_p1  ;;  %p30_p5 = scmp.ge.s32.totalorder %s2883_s23, 2 }
   0xb   : > { %p129_p6 = scmp.ne.s32.totalorder %s1834_s13, %s1830_s12  ;;  %p1940_p7 = por %p124_p4, %p42_p1 }
   0xc   : > { %p130_p8 = scmp.eq.s32.totalorder %s1488_s21, 3  ;;  %s2885_s23 = smov (%p30_p5, %s2883_s23), 0 }
   0xd   : > { %s32_s27 = ssub.s32 %s1854_s18, %s2885_s23  ;;  %s35_s28 = sadd.s32 1, %s1838_s14 }
   0xe   : > { %p1946_p9 = por %p130_p8, %p129_p6  ;;  %p33_p10 = scmp.eq.s32.totalorder %s32_s27, 0 }
   0xf   : > { %p1490_p11 = scmp.ge.s32.totalorder %s1858_s19, 4 }
  0x10   : > { %s1954_s29 = scalar_select %p33_p10, %s1838_s14, %s35_s28  }
  0x11   : > { %146 = sbr.rel (%p1490_p11) target bundleno = 40 (0x28), region = 16 }
  0x18   : > { %149 = sbr.rel (!%p1934_p3) target bundleno = 40 (0x28), region = 20  ;;  %s151_s30 = sand.u32 (%p1934_p3), 1, %s1838_s14  }
  0x19   : > { %s1491_s4 = sshll.u32 (%p1934_p3), %s1854_s18, 2  ;;  %s1561_s5 = smul.u32 (%p1934_p3), 72, %s151_s30 }
  0x1a   : > { %s1964_s8 = scalar_lea.vmem (%p1934_p3), %s2748_s0, %s1491_s4 }
  0x1b   : > { %v171_v0 = vld [vmem:[%s1964_s8] sm:$0xf] (%p1934_p3)  ;;  %v173_v1 = vld [vmem:[%s1964_s8 + $0x8] sm:$0xf] (%p1934_p3)  ;;  %v175_v2 = vld [vmem:[%s1964_s8 + $0x10] sm:$0xf] (%p1934_p3) }
  0x1c   : > { %v177_v3 = vld [vmem:[%s1964_s8 + $0x18] sm:$0xf] (%p1934_p3)  ;;  %v179_v4 = vld [vmem:[%s1964_s8 + $0x20] sm:$0xf] (%p1934_p3)  ;;  %s1971_s9 = scalar_lea.vmem (%p1934_p3), [#allocation5], %s1561_s5 }
  0x1d   : > { %172 = vst [vmem:[%s1971_s9] sm:$0xf] (%p1934_p3), %v171_v0  ;;  %174 = vst [vmem:[%s1971_s9 + $0x4] sm:$0xf] (%p1934_p3), %v173_v1  ;;  %v181_v5 = vld [vmem:[%s1964_s8 + $0x28] sm:$0xf] (%p1934_p3) }
  0x1e   : > { %176 = vst [vmem:[%s1971_s9 + $0x8] sm:$0xf] (%p1934_p3), %v175_v2  ;;  %178 = vst [vmem:[%s1971_s9 + $0xc] sm:$0xf] (%p1934_p3), %v177_v3  ;;  %v183_v6 = vld [vmem:[%s1964_s8 + $0x30] sm:$0xf] (%p1934_p3) }
  0x1f   : > { %180 = vst [vmem:[%s1971_s9 + $0x10] sm:$0xf] %v179_v4  ;;  %v185_v7 = vld [vmem:[%s1964_s8 + $0x38] sm:$0xf]  ;;  %182 = vst [vmem:[%s1971_s9 + $0x14] sm:$0xf] %v181_v5 }
  0x20   : > { %184 = vst [vmem:[%s1971_s9 + $0x18] sm:$0xf] %v183_v6  ;;  %186 = vst [vmem:[%s1971_s9 + $0x1c] sm:$0xf] %v185_v7  ;;  %v187_v8 = vld [vmem:[%s1964_s8 + $0x40] sm:$0xf] }
  0x21   : > { %v189_v9 = vld [vmem:[%s1964_s8 + $0x48] sm:$0xf]  ;;  %v191_v10 = vld [vmem:[%s1964_s8 + $0x50] sm:$0xf]  ;;  %188 = vst [vmem:[%s1971_s9 + $0x20] sm:$0xf] %v187_v8 }
  0x22   : > { %190 = vst [vmem:[%s1971_s9 + $0x24] sm:$0xf] %v189_v9  ;;  %192 = vst [vmem:[%s1971_s9 + $0x28] sm:$0xf] %v191_v10  ;;  %v193_v11 = vld [vmem:[%s1964_s8 + $0x58] sm:$0xf] }
  0x23   : > { %v195_v12 = vld [vmem:[%s1964_s8 + $0x60] sm:$0xf]  ;;  %v197_v13 = vld [vmem:[%s1964_s8 + $0x68] sm:$0xf]  ;;  %194 = vst [vmem:[%s1971_s9 + $0x2c] sm:$0xf] %v193_v11 }
  0x24   : > { %196 = vst [vmem:[%s1971_s9 + $0x30] sm:$0xf] %v195_v12  ;;  %198 = vst [vmem:[%s1971_s9 + $0x34] sm:$0xf] %v197_v13  ;;  %v199_v14 = vld [vmem:[%s1964_s8 + $0x70] sm:$0xf] }
  0x25   : > { %v201_v15 = vld [vmem:[%s1964_s8 + $0x78] sm:$0xf]  ;;  %v203_v16 = vld [vmem:[%s1964_s8 + $0x80] sm:$0xf]  ;;  %200 = vst [vmem:[%s1971_s9 + $0x38] sm:$0xf] %v199_v14 }
  0x26   : > { %202 = vst [vmem:[%s1971_s9 + $0x3c] sm:$0xf] %v201_v15  ;;  %204 = vst [vmem:[%s1971_s9 + $0x40] sm:$0xf] %v203_v16  ;;  %v205_v17 = vld [vmem:[%s1964_s8 + $0x88] sm:$0xf] }
  0x27   : > { %206 = vst [vmem:[%s1971_s9 + $0x44] sm:$0xf] %v205_v17 }
  0x28 PF: > { %p1492_p12 = scmp.ge.s32.totalorder %s1858_s19, 1  ;;  %p280_p13 = scmp.lt.s32.totalorder %s1858_s19, 5 }
  0x2a   : > { %p281_p0 = pnand %p1492_p12, %p280_p13 }
  0x2c   : > { %284 = sbr.rel (%p281_p0) target bundleno = 521 (0x209), region = 69 }
  0x33   : > { %s2007_s10 = sand.u32 1, %s1834_s13   ;;  %s1493_s11 = sshll.u32 %s1842_s15, 5 }
  0x34   : > { %s1562_s20 = smul.u32 72, %s2007_s10  ;;  %p319_p1 = scmp.lt.s32.totalorder %s1493_s11, 63 }
  0x35   : > { %p325_p2 = scmp.lt.s32.totalorder %s1846_s16, 1  ;;  %s317_s8 = scalar_lea.vmem [#allocation6], %s2007_s10 }
  0x36   : > { %s2887_s11 = smov (!%p319_p1, %s1493_s11), 63  ;;  %s2024_s7 = scalar_lea.vmem [#allocation5], %s1562_s20 }
  0x37   : > { %s2013_s21 = scalar_select %p325_p2, %s1846_s16, 1 }
  0x38   : > { %s1560_s24 = sshll.u32 %s2887_s11, 3  ;;  %p1496_p3 = scmp.ne.s32.totalorder %s1842_s15, 0 }
  0x39   : > { %s2018_s30 = scalar_lea.vmem %s2749_s1, %s1560_s24  ;;  %s327_s6 = scalar_lea.vmem %s2750_s2, %s2013_s21  ;;  %v1860_v18 = vmov (!%p1496_p3), -1e+30   ;;  %v1861_v19 = vmov (!%p1496_p3), 0.0  }
  0x3a   : > { %332 = sbr.rel (%p1496_p3) target bundleno = 65 (0x41), region = 77  ;;  %333 = vst [vmem:[#allocation2] sm:$0x1] (!%p1496_p3), %v1860_v18  ;;  %334 = vst [vmem:[#allocation3] sm:$0x1] (!%p1496_p3), %v1861_v19 }
  0x3b   : > { %335 = vst [vmem:[#allocation4] sm:$0x1] (!%p1496_p3), %v1861_v19 }
  0x41 PF: > { %v1637_v20 = vld [vmem:[%s2024_s7] sm:$0xff]   ;;  %v1862_v21 = vmov 0   ;;  %v1638_v22 = vld [vmem:[%s2024_s7 + $0x8] sm:$0xff]   ;;  %v1639_v23 = vld [vmem:[%s2024_s7 + $0x10] sm:$0xff]   ;;  %vm497_vm0 = vcmask 130048   ;;  %v620_v62 = vlaneseq  ;;  %s1530_s9 = sshll.u32 %s1842_s15, 8 }
  0x42   : > { %522 = vmatprep.subr.bf16.mxu0 %v1862_v21  ;;  %1012 = vmatprep.subr.bf16.mxu1 %v1862_v21  ;;  %v1640_v24 = vld [vmem:[%s2024_s7 + $0x18] sm:$0xff]   ;;  %v1641_v27 = vld [vmem:[%s2024_s7 + $0x20] sm:$0xff]   ;;  %v1642_v28 = vld [vmem:[%s2024_s7 + $0x28] sm:$0xff]   ;;  %s1109_s11 = sadd.s32 128, %s1530_s9  ;;  %v2090_v1 = vstv %s1530_s9  ;;  %p1556_p4 = scmp.ne.s32.totalorder %s1842_s15, 1 }
  0x43   : > { %523 = vmatpush1.bf16.msra.mxu0 %v1637_v20  ;;  %1013 = vmatpush1.bf16.msra.mxu1 %v1637_v20  ;;  %v1648_v25 = vld [vmem:[%s2018_s30 + $0x4] ss:$8 sps:$4 sm:$0xff]   ;;  %v1643_v29 = vld [vmem:[%s2024_s7 + $0x30] sm:$0xff]   ;;  %v2086_v63 = vshrl.u32 %v620_v62, 7  ;;  %v2088_v0 = vstv %s1109_s11 }
  0x44   : > { %524 = vmatprep.subr.bf16.mxu0 %v1862_v21  ;;  %1014 = vmatprep.subr.bf16.mxu1 %v1862_v21  ;;  %v1651_v26 = vld [vmem:[%s2018_s30 + $0x84] ss:$8 sps:$4 sm:$0xff]   ;;  %v1646_v32 = vld [vmem:[%s2018_s30] ss:$8 sps:$4 sm:$0xff]   ;;  %v1652_v34 = vld [vmem:[%s2018_s30 + $0x14] ss:$8 sps:$4 sm:$0xff]  }
  0x45   : > { %1522 = vmatprep.mubr.msk.bf16.mxu0 %vm497_vm0, %v1648_v25  ;;  %1548 = vmatprep.mubr.msk.bf16.mxu1 %vm497_vm0, %v1651_v26  ;;  %v1644_v30 = vld [vmem:[%s2024_s7 + $0x38] sm:$0xff]   ;;  %v1645_v31 = vld [vmem:[%s2024_s7 + $0x40] sm:$0xff]   ;;  %v622_v2 = vadd.s32 8, %v2086_v63  ;;  %v2095_v3 = vadd.s32 %v2088_v0, %v2086_v63  ;;  %v2099_v4 = vadd.s32 %v2090_v1, %v2086_v63  ;;  %v623_v8 = vadd.s32 16, %v2086_v63 }
  0x46   : > { %v1649_v33 = vld [vmem:[%s2018_s30 + $0x80] ss:$8 sps:$4 sm:$0xff]   ;;  %v1654_v35 = vld [vmem:[%s2018_s30 + $0x94] ss:$8 sps:$4 sm:$0xff]   ;;  %v1656_v36 = vld [vmem:[%s2018_s30 + $0x10] ss:$8 sps:$4 sm:$0xff]  }
  0x47   : > { %525 = vmatpush1.bf16.msra.mxu0 %v1638_v22  ;;  %1015 = vmatpush1.bf16.msra.mxu1 %v1638_v22  ;;  %v1657_v37 = vld [vmem:[%s2018_s30 + $0x90] ss:$8 sps:$4 sm:$0xff]   ;;  %v1658_v38 = vld [vmem:[%s2018_s30 + $0x24] ss:$8 sps:$4 sm:$0xff]   ;;  %v1662_v40 = vld [vmem:[%s2018_s30 + $0x20] ss:$8 sps:$4 sm:$0xff]   ;;  %v2109_v6 = vadd.s32 %v2090_v1, %v622_v2  ;;  %v2112_v7 = vadd.s32 %v2088_v0, %v622_v2  ;;  %v2129_v13 = vadd.s32 %v2090_v1, %v623_v8 }
  0x48   : > { %526 = vmatprep.subr.bf16.mxu0 %v1862_v21  ;;  %1016 = vmatprep.subr.bf16.mxu1 %v1862_v21  ;;  %v1660_v39 = vld [vmem:[%s2018_s30 + $0xa4] ss:$8 sps:$4 sm:$0xff]   ;;  %v1663_v41 = vld [vmem:[%s2018_s30 + $0xa0] ss:$8 sps:$4 sm:$0xff]   ;;  %v1664_v42 = vld [vmem:[%s2018_s30 + $0x34] ss:$8 sps:$4 sm:$0xff]  }
  0x49   : > { %v1666_v43 = vld [vmem:[%s2018_s30 + $0xb4] ss:$8 sps:$4 sm:$0xff]   ;;  %v1668_v44 = vld [vmem:[%s2018_s30 + $0x30] ss:$8 sps:$4 sm:$0xff]   ;;  %v1670_v46 = vld [vmem:[%s2018_s30 + $0x44] ss:$8 sps:$4 sm:$0xff]  }
  0x4a   : > { %v1669_v45 = vld [vmem:[%s2018_s30 + $0xb0] ss:$8 sps:$4 sm:$0xff]   ;;  %v1672_v47 = vld [vmem:[%s2018_s30 + $0xc4] ss:$8 sps:$4 sm:$0xff]   ;;  %v1674_v48 = vld [vmem:[%s2018_s30 + $0x40] ss:$8 sps:$4 sm:$0xff]  }
  0x4b   : > { %527 = vmatpush1.bf16.msra.mxu0 %v1639_v23  ;;  %1017 = vmatpush1.bf16.msra.mxu1 %v1639_v23  ;;  %v1675_v49 = vld [vmem:[%s2018_s30 + $0xc0] ss:$8 sps:$4 sm:$0xff]   ;;  %v1676_v50 = vld [vmem:[%s2018_s30 + $0x54] ss:$8 sps:$4 sm:$0xff]   ;;  %v1680_v52 = vld [vmem:[%s2018_s30 + $0x50] ss:$8 sps:$4 sm:$0xff]  }
  0x4c   : > { %528 = vmatprep.subr.bf16.mxu0 %v1862_v21  ;;  %1018 = vmatprep.subr.bf16.mxu1 %v1862_v21  ;;  %v1678_v51 = vld [vmem:[%s2018_s30 + $0xd4] ss:$8 sps:$4 sm:$0xff]   ;;  %v1681_v53 = vld [vmem:[%s2018_s30 + $0xd0] ss:$8 sps:$4 sm:$0xff]   ;;  %v1682_v54 = vld [vmem:[%s2018_s30 + $0x64] ss:$8 sps:$4 sm:$0xff]  }
  0x4d   : > { %v1684_v55 = vld [vmem:[%s2018_s30 + $0xe4] ss:$8 sps:$4 sm:$0xff]   ;;  %v1686_v56 = vld [vmem:[%s2018_s30 + $0x60] ss:$8 sps:$4 sm:$0xff]   ;;  %v1688_v58 = vld [vmem:[%s2018_s30 + $0x74] ss:$8 sps:$4 sm:$0xff]  }
  0x4e   : > { %v1687_v57 = vld [vmem:[%s2018_s30 + $0xe0] ss:$8 sps:$4 sm:$0xff]   ;;  %v1690_v59 = vld [vmem:[%s2018_s30 + $0xf4] ss:$8 sps:$4 sm:$0xff]   ;;  %v1692_v60 = vld [vmem:[%s2018_s30 + $0x70] ss:$8 sps:$4 sm:$0xff]  }
  0x4f   : > { %529 = vmatpush1.bf16.msra.mxu0 %v1640_v24  ;;  %1019 = vmatpush1.bf16.msra.mxu1 %v1640_v24  ;;  %v1693_v61 = vld [vmem:[%s2018_s30 + $0xf0] ss:$8 sps:$4 sm:$0xff]   ;;  %2801 = vst [vmem:[#allocation9_spill] sm:$0xff] %v2095_v3  ;;  %v2106_v5 = vld [vmem:[%s327_s6] ss:$0 sm:$0xff]  ;;  %2802 = vst [vmem:[#allocation10_spill] sm:$0xff] %v2112_v7 }
  0x50   : > { %530 = vmatprep.subr.bf16.mxu0 %v1862_v21  ;;  %1020 = vmatprep.subr.bf16.mxu1 %v1862_v21  ;;  %vm1143_vm1 = vcmp.eq.s32.totalorder %v2095_v3, %v2106_v5  ;;  %v624_v9 = vadd.s32 24, %v2086_v63  ;;  %vm654_vm2 = vcmp.lt.s32.totalorder %v2099_v4, 384  ;;  %vm674_vm3 = vcmp.eq.s32.totalorder %v2099_v4, %v2106_v5 }
  0x51   : > { %vm655_vm4 = vcmp.lt.s32.totalorder %v2109_v6, 384  ;;  %vm675_vm5 = vcmp.eq.s32.totalorder %v2109_v6, %v2106_v5  ;;  %vm1144_vm6 = vcmp.eq.s32.totalorder %v2112_v7, %v2106_v5  ;;  %vm656_vm7 = vcmp.lt.s32.totalorder %v2129_v13, 384 }
  0x52   : > { %v2137_v19 = vadd.s32 %v2090_v1, %v624_v9  ;;  %vm676_vm8 = vcmp.eq.s32.totalorder %v2129_v13, %v2106_v5  ;;  %vm2762_vm12 = vcmp.lt.s32.totalorder %v2095_v3, 384  ;;  %vm2759_vm14 = vcmp.lt.s32.totalorder %v2112_v7, 384 }
  0x53   : > { %531 = vmatpush1.bf16.msra.mxu0 %v1641_v27  ;;  %1021 = vmatpush1.bf16.msra.mxu1 %v1641_v27  ;;  %v2150_v27 = vadd.s32 %v2088_v0, %v624_v9 }
  0x54   : > { %532 = vmatprep.subr.bf16.mxu0 %v1862_v21  ;;  %1022 = vmatprep.subr.bf16.mxu1 %v1862_v21  ;;  %vm2752_vm10 = vcmp.lt.s32.totalorder %v2137_v19, 384  ;;  %vm677_vm11 = vcmp.eq.s32.totalorder %v2137_v19, %v2106_v5 }
  0x55   : > { %2804 = vst [vmem:[#allocation12_spill] sm:$0xff] %v2150_v27  ;;  %vm1146_vm13 = vcmp.eq.s32.totalorder %v2150_v27, %v2106_v5 }
  0x57   : > { %533 = vmatpush1.bf16.msra.mxu0 %v1642_v28  ;;  %1023 = vmatpush1.bf16.msra.mxu1 %v1642_v28 }
  0x58   : > { %534 = vmatprep.subr.bf16.mxu0 %v1862_v21  ;;  %1024 = vmatprep.subr.bf16.mxu1 %v1862_v21 }
  0x5b   : > { %535 = vmatpush1.bf16.msra.mxu0 %v1643_v29  ;;  %1025 = vmatpush1.bf16.msra.mxu1 %v1643_v29 }
  0x5c   : > { %536 = vmatprep.subr.bf16.mxu0 %v1862_v21  ;;  %1026 = vmatprep.subr.bf16.mxu1 %v1862_v21 }
  0x5f   : > { %537 = vmatpush1.bf16.msra.mxu0 %v1644_v30  ;;  %1027 = vmatpush1.bf16.msra.mxu1 %v1644_v30 }
  0x60   : > { %538 = vmatprep.subr.bf16.mxu0 %v1862_v21  ;;  %1028 = vmatprep.subr.bf16.mxu1 %v1862_v21  ;;  %v2142_v21 = vadd.s32 %v2088_v0, %v623_v8 }
  0x62   : > { %2803 = vst [vmem:[#allocation11_spill] sm:$0xff] %v2142_v21  ;;  %vm1145_vm9 = vcmp.eq.s32.totalorder %v2142_v21, %v2106_v5  ;;  %vm2757_vm15 = vcmp.lt.s32.totalorder %v2142_v21, 384 }
  0x63   : > { %539 = vmatpush1.bf16.msra.mxu0 %v1645_v31  ;;  %1029 = vmatpush1.bf16.msra.mxu1 %v1645_v31  ;;  %v625_v31 = vadd.s32 32, %v2086_v63 }
  0x66   : > { %555 = vmatmul.mubr.bf16.vlgmr.msra.gmra.mrb[0].mxu0 %v1646_v32  ;;  %1045 = vmatmul.mubr.bf16.vlgmr.msra.gmra.mrb[0].mxu1 %v1649_v33  ;;  %v626_v32 = vadd.s32 40, %v2086_v63  ;;  %v627_v33 = vadd.s32 48, %v2086_v63 }
  0x67   : > { %1523 = vmatprep.mubr.msk.bf16.mxu0 %vm497_vm0, %v1652_v34  ;;  %1549 = vmatprep.mubr.msk.bf16.mxu1 %vm497_vm0, %v1654_v35 }
  0x68   : > { %v2229_v8 = vadd.s32 %v2088_v0, %v627_v33 }
  0x6a   : > { %2808 = vst [vmem:[#allocation16_spill] sm:$0xff] %v2229_v8 }
  0x6e   : > { %563 = vmatmul.mubr.bf16.gmra.mrb[4].mxu0 %v1656_v36  ;;  %1053 = vmatmul.mubr.bf16.gmra.mrb[4].mxu1 %v1657_v37  ;;  %v2171_v36 = vadd.s32 %v2090_v1, %v625_v31  ;;  %v2174_v37 = vadd.s32 %v2088_v0, %v625_v31  ;;  %v629_v31 = vadd.s32 64, %v2086_v63 }
  0x6f   : > { %1524 = vmatprep.mubr.msk.bf16.mxu0 %vm497_vm0, %v1658_v38  ;;  %1550 = vmatprep.mubr.msk.bf16.mxu1 %vm497_vm0, %v1660_v39 }
  0x70   : > { %2805 = vst [vmem:[#allocation13_spill] sm:$0xff] %v2174_v37 }
  0x76   : > { %571 = vmatmul.mubr.bf16.gmra.mrb[8].mxu0 %v1662_v40  ;;  %1061 = vmatmul.mubr.bf16.gmra.mrb[8].mxu1 %v1663_v41 }
  0x77   : > { %1525 = vmatprep.mubr.msk.bf16.mxu0 %vm497_vm0, %v1664_v42  ;;  %1551 = vmatprep.mubr.msk.bf16.mxu1 %vm497_vm0, %v1666_v43  ;;  %v2182_v43 = vadd.s32 %v2090_v1, %v626_v32 }
  0x7e   : > { %579 = vmatmul.mubr.bf16.gmra.mrb[12].mxu0 %v1668_v44  ;;  %1069 = vmatmul.mubr.bf16.gmra.mrb[12].mxu1 %v1669_v45 }
  0x7f   : > { %1526 = vmatprep.mubr.msk.bf16.mxu0 %vm497_vm0, %v1670_v46  ;;  %1552 = vmatprep.mubr.msk.bf16.mxu1 %vm497_vm0, %v1672_v47 }
  0x86   : > { %587 = vmatmul.mubr.bf16.gmra.mrb[16].mxu0 %v1674_v48  ;;  %1077 = vmatmul.mubr.bf16.gmra.mrb[16].mxu1 %v1675_v49  ;;  %v2186_v49 = vadd.s32 %v2088_v0, %v626_v32 }
  0x87   : > { %1527 = vmatprep.mubr.msk.bf16.mxu0 %vm497_vm0, %v1676_v50  ;;  %1553 = vmatprep.mubr.msk.bf16.mxu1 %vm497_vm0, %v1678_v51 }
  0x88   : > { %2806 = vst [vmem:[#allocation14_spill] sm:$0xff] %v2186_v49 }
  0x8e   : > { %595 = vmatmul.mubr.bf16.gmra.mrb[20].mxu0 %v1680_v52  ;;  %1085 = vmatmul.mubr.bf16.gmra.mrb[20].mxu1 %v1681_v53 }
  0x8f   : > { %1528 = vmatprep.mubr.msk.bf16.mxu0 %vm497_vm0, %v1682_v54  ;;  %1554 = vmatprep.mubr.msk.bf16.mxu1 %vm497_vm0, %v1684_v55  ;;  %v2199_v55 = vadd.s32 %v2090_v1, %v627_v33 }
  0x91   : > { %2807 = vst [vmem:[#allocation15_spill] sm:$0xff] %v2199_v55 }
  0x96   : > { %603 = vmatmul.mubr.bf16.gmra.mrb[24].mxu0 %v1686_v56  ;;  %1093 = vmatmul.mubr.bf16.gmra.mrb[24].mxu1 %v1687_v57 }
  0x97   : > { %1529 = vmatprep.mubr.msk.bf16.mxu0 %vm497_vm0, %v1688_v58  ;;  %1555 = vmatprep.mubr.msk.bf16.mxu1 %vm497_vm0, %v1690_v59  ;;  %v628_v59 = vadd.s32 56, %v2086_v63  ;;  %vm2754_vm0 = vcmp.lt.s32.totalorder %v2150_v27, 384 }
  0x99   : > { %v2232_v9 = vadd.s32 %v2090_v1, %v628_v59 }
  0x9b   : > { %2809 = vst [vmem:[#allocation17_spill] sm:$0xff] %v2232_v9 }
  0x9e   : > { %611 = vmatmul.mubr.bf16.gmra.mrb[28].mxu0 %v1692_v60  ;;  %1101 = vmatmul.mubr.bf16.gmra.mrb[28].mxu1 %v1693_v61 }
 0x139   : > { %v556_v10 = vpop.f32.mrb[0].mxu0  ;;  %v2124_v11 = vpop.f32.mrb[0].mxu1 }
 0x13a   : > { %v558_v12 = vpop.f32.mrb[1].mxu0  ;;  %v1160_v14 = vsel %vm1143_vm1, %v2124_v11, 0.0  ;;  %v1048_v15 = vpop.f32.mrb[1].mxu1  ;;  %v691_v16 = vsel %vm674_vm3, %v556_v10, 0.0  ;;  %v2134_v17 = vsel %vm654_vm2, %v556_v10, -1e+30  ;;  %vm678_vm3 = vcmp.eq.s32.totalorder %v2171_v36, %v2106_v5 }
 0x13b   : > { %v559_v18 = vpop.f32.mrb[2].mxu0  ;;  %v2139_v20 = vpop.f32.mrb[2].mxu1  ;;  %vm658_vm1 = vcmp.lt.s32.totalorder %v2171_v36, 384  ;;  %v2222_v60 = vsel %vm2762_vm12, %v2124_v11, -1e+30 }
 0x13c   : > { %v692_v22 = vsel %vm675_vm5, %v559_v18, 0.0  ;;  %v2146_v23 = vsel %vm655_vm4, %v559_v18, -1e+30  ;;  %v561_v24 = vpop.f32.mrb[3].mxu0  ;;  %v1161_v25 = vsel %vm1144_vm6, %v2139_v20, 0.0  ;;  %v1051_v26 = vpop.f32.mrb[3].mxu1  ;;  %vm1147_vm6 = vcmp.eq.s32.totalorder %v2174_v37, %v2106_v5 }
 0x13d   : > { %v707_v28 = vadd.f32 %v692_v22, %v691_v16  ;;  %v779_v29 = vmax.f32 %v2134_v17, %v2146_v23  ;;  %v1176_v30 = vadd.f32 %v1161_v25, %v1160_v14  ;;  %vm2753_vm5 = vcmp.lt.s32.totalorder %v2174_v37, 384 }
 0x13e   : > { %v2248_v26 = vsel %vm2759_vm14, %v2139_v20, -1e+30 }
 0x141   : > { %v564_v34 = vpop.f32.mrb[4].mxu0  ;;  %v2166_v35 = vpop.f32.mrb[4].mxu1 }
 0x142   : > { %v693_v38 = vsel %vm676_vm8, %v564_v34, 0.0  ;;  %v2178_v39 = vsel %vm656_vm7, %v564_v34, -1e+30  ;;  %v566_v40 = vpop.f32.mrb[5].mxu0  ;;  %v1162_v41 = vsel %vm1145_vm9, %v2166_v35, 0.0  ;;  %v1056_v42 = vpop.f32.mrb[5].mxu1  ;;  %vm679_vm9 = vcmp.eq.s32.totalorder %v2182_v43, %v2106_v5 }
 0x143   : > { %v708_v44 = vadd.f32 %v707_v28, %v693_v38  ;;  %v780_v45 = vmax.f32 %v2178_v39, %v779_v29  ;;  %v567_v46 = vpop.f32.mrb[6].mxu0  ;;  %v1177_v47 = vadd.f32 %v1176_v30, %v1162_v41  ;;  %v1057_v48 = vpop.f32.mrb[6].mxu1  ;;  %vm659_vm8 = vcmp.lt.s32.totalorder %v2182_v43, 384 }
 0x144   : > { %v694_v50 = vsel %vm677_vm11, %v567_v46, 0.0  ;;  %v2193_v51 = vsel %vm2752_vm10, %v567_v46, -1e+30  ;;  %v569_v52 = vpop.f32.mrb[7].mxu0  ;;  %v1163_v53 = vsel %vm1146_vm13, %v1057_v48, 0.0  ;;  %v1059_v54 = vpop.f32.mrb[7].mxu1  ;;  %vm1148_vm13 = vcmp.eq.s32.totalorder %v2186_v49, %v2106_v5 }
 0x145   : > { %v709_v56 = vadd.f32 %v708_v44, %v694_v50  ;;  %v781_v57 = vmax.f32 %v2193_v51, %v780_v45  ;;  %v1178_v58 = vadd.f32 %v1177_v47, %v1163_v53  ;;  %vm2755_vm11 = vcmp.lt.s32.totalorder %v2186_v49, 384 }
 0x146   : > { %vm660_vm10 = vcmp.lt.s32.totalorder %v2199_v55, 384  ;;  %v2226_v61 = vsel %vm2754_vm0, %v1057_v48, -1e+30  ;;  %v2253_v30 = vadd.s32 %v2088_v0, %v628_v59  ;;  %v2282_v47 = vadd.s32 %v2090_v1, %v629_v31 }
 0x147   : > { %v630_v48 = vadd.s32 72, %v2086_v63  ;;  %v2288_v50 = vsel %vm2757_vm15, %v2166_v35, -1e+30 }
 0x148   : > { %2810 = vst [vmem:[#allocation18_spill] sm:$0xff] %v2253_v30  ;;  %vm2758_vm0 = vcmp.lt.s32.totalorder %v2253_v30, 384  ;;  %2811 = vst [vmem:[#allocation19_spill] sm:$0xff] %v2282_v47 }
 0x149   : > { %v572_v62 = vpop.f32.mrb[8].mxu0  ;;  %v1062_v2 = vpop.f32.mrb[8].mxu1 }
 0x14a   : > { %v695_v10 = vsel %vm678_vm3, %v572_v62, 0.0  ;;  %v2236_v12 = vsel %vm658_vm1, %v572_v62, -1e+30  ;;  %v1164_v14 = vsel %vm1147_vm6, %v1062_v2, 0.0  ;;  %v2240_v11 = vsel %vm2753_vm5, %v1062_v2, -1e+30 }
 0x14b   : > { %v710_v15 = vadd.f32 %v709_v56, %v695_v10  ;;  %v782_v16 = vmax.f32 %v2236_v12, %v781_v57  ;;  %v1179_v18 = vadd.f32 %v1178_v58, %v1164_v14  ;;  %v1248_v22 = vmax.f32 %v2222_v60, %v2240_v11  ;;  %v574_v24 = vpop.f32.mrb[9].mxu0  ;;  %v1064_v25 = vpop.f32.mrb[9].mxu1 }
 0x14c   : > { %v575_v28 = vpop.f32.mrb[10].mxu0  ;;  %v1065_v29 = vpop.f32.mrb[10].mxu1  ;;  %vm680_vm3 = vcmp.eq.s32.totalorder %v2199_v55, %v2106_v5  ;;  %vm2756_vm6 = vcmp.lt.s32.totalorder %v2229_v8, 384  ;;  %vm681_vm5 = vcmp.eq.s32.totalorder %v2232_v9, %v2106_v5  ;;  %v2293_v56 = vadd.s32 %v2088_v0, %v629_v31 }
 0x14d   : > { %v1251_v32 = vmax.f32 %v2226_v61, %v1248_v22  ;;  %v696_v33 = vsel %vm679_vm9, %v575_v28, 0.0  ;;  %v2262_v20 = vsel %vm659_vm8, %v575_v28, -1e+30  ;;  %v1165_v34 = vsel %vm1148_vm13, %v1065_v29, 0.0  ;;  %v577_v38 = vpop.f32.mrb[11].mxu0  ;;  %v1067_v40 = vpop.f32.mrb[11].mxu1 }
 0x14e   : > { %v711_v41 = vadd.f32 %v710_v15, %v696_v33  ;;  %v783_v42 = vmax.f32 %v2262_v20, %v782_v16  ;;  %v1180_v44 = vadd.f32 %v1179_v18, %v1165_v34  ;;  %v2270_v45 = vsel %vm2755_vm11, %v1065_v29, -1e+30  ;;  %2812 = vst [vmem:[#allocation20_spill] sm:$0xff] %v2293_v56 }
 0x14f   : > { %v1249_v46 = vmax.f32 %v2248_v26, %v2270_v45  ;;  %vm1149_vm9 = vcmp.eq.s32.totalorder %v2229_v8, %v2106_v5  ;;  %vm2785_vm13 = vcmp.lt.s32.totalorder %v2232_v9, 384  ;;  %vm1150_vm11 = vcmp.eq.s32.totalorder %v2253_v30, %v2106_v5 }
 0x150   : > { %v2311_v24 = vadd.s32 %v2090_v1, %v630_v48  ;;  %v2314_v25 = vadd.s32 %v2088_v0, %v630_v48  ;;  %v631_v28 = vadd.s32 80, %v2086_v63  ;;  %v632_v48 = vadd.s32 88, %v2086_v63 }
 0x151   : > { %v1252_v52 = vmax.f32 %v1249_v46, %v1251_v32  ;;  %v580_v53 = vpop.f32.mrb[12].mxu0  ;;  %v1070_v54 = vpop.f32.mrb[12].mxu1 }
 0x152   : > { %v697_v57 = vsel %vm680_vm3, %v580_v53, 0.0  ;;  %v2300_v58 = vsel %vm660_vm10, %v580_v53, -1e+30  ;;  %v1166_v59 = vsel %vm1149_vm9, %v1070_v54, 0.0  ;;  %v2304_v35 = vsel %vm2756_vm6, %v1070_v54, -1e+30 }
 0x153   : > { %v712_v62 = vadd.f32 %v711_v41, %v697_v57  ;;  %v784_v2 = vmax.f32 %v2300_v58, %v783_v42  ;;  %v1181_v10 = vadd.f32 %v1180_v44, %v1166_v59  ;;  %v1250_v14 = vmax.f32 %v2288_v50, %v2304_v35  ;;  %v582_v15 = vpop.f32.mrb[13].mxu0  ;;  %v1072_v16 = vpop.f32.mrb[13].mxu1  ;;  %2813 = vst [vmem:[#allocation21_spill] sm:$0xff] %v2311_v24 }
 0x154   : > { %v583_v18 = vpop.f32.mrb[14].mxu0  ;;  %v1073_v22 = vpop.f32.mrb[14].mxu1  ;;  %vm2774_vm3 = vcmp.lt.s32.totalorder %v2282_v47, 384  ;;  %2814 = vst [vmem:[#allocation22_spill] sm:$0xff] %v2314_v25  ;;  %vm2761_vm9 = vcmp.lt.s32.totalorder %v2293_v56, 384  ;;  %vm2763_vm6 = vcmp.lt.s32.totalorder %v2311_v24, 384  ;;  %vm683_vm15 = vcmp.eq.s32.totalorder %v2311_v24, %v2106_v5 }
 0x155   : > { %v1253_v29 = vmax.f32 %v1250_v14, %v1252_v52  ;;  %v698_v31 = vsel %vm681_vm5, %v583_v18, 0.0  ;;  %v2322_v32 = vsel %vm2785_vm13, %v583_v18, -1e+30  ;;  %v1167_v33 = vsel %vm1150_vm11, %v1073_v22, 0.0  ;;  %v585_v34 = vpop.f32.mrb[15].mxu0  ;;  %v1075_v38 = vpop.f32.mrb[15].mxu1 }
 0x156   : > { %v713_v40 = vadd.f32 %v712_v62, %v698_v31  ;;  %v785_v41 = vmax.f32 %v2322_v32, %v784_v2  ;;  %v1182_v42 = vadd.f32 %v1181_v10, %v1167_v33  ;;  %v2330_v44 = vsel %vm2758_vm0, %v1073_v22, -1e+30 }
 0x157   : > { %v1254_v46 = vmax.f32 %v2330_v44, %v1253_v29  ;;  %vm682_vm5 = vcmp.eq.s32.totalorder %v2282_v47, %v2106_v5  ;;  %vm1151_vm11 = vcmp.eq.s32.totalorder %v2293_v56, %v2106_v5  ;;  %vm2760_vm0 = vcmp.lt.s32.totalorder %v2314_v25, 384 }
 0x158   : > { %vm1152_vm14 = vcmp.eq.s32.totalorder %v2314_v25, %v2106_v5  ;;  %v2346_v54 = vadd.s32 %v2090_v1, %v631_v28  ;;  %v2349_v57 = vadd.s32 %v2088_v0, %v631_v28  ;;  %v2362_v33 = vadd.s32 %v2090_v1, %v632_v48 }
 0x159   : > { %v588_v52 = vpop.f32.mrb[16].mxu0  ;;  %v1078_v53 = vpop.f32.mrb[16].mxu1  ;;  %v2365_v34 = vadd.s32 %v2088_v0, %v632_v48  ;;  %v633_v38 = vadd.s32 96, %v2086_v63 }
 0x15a   : > { %2815 = vst [vmem:[#allocation23_spill] sm:$0xff] %v2346_v54  ;;  %2816 = vst [vmem:[#allocation24_spill] sm:$0xff] %v2349_v57  ;;  %v699_v59 = vsel %vm682_vm5, %v588_v52, 0.0  ;;  %v2353_v62 = vsel %vm2774_vm3, %v588_v52, -1e+30  ;;  %v1168_v2 = vsel %vm1151_vm11, %v1078_v53, 0.0  ;;  %vm684_vm5 = vcmp.eq.s32.totalorder %v2346_v54, %v2106_v5 }
 0x15b   : > { %v2357_v10 = vsel %vm2761_vm9, %v1078_v53, -1e+30  ;;  %v714_v14 = vadd.f32 %v713_v40, %v699_v59  ;;  %v786_v15 = vmax.f32 %v2353_v62, %v785_v41  ;;  %v1183_v16 = vadd.f32 %v1182_v42, %v1168_v2  ;;  %v590_v22 = vpop.f32.mrb[17].mxu0  ;;  %v1080_v29 = vpop.f32.mrb[17].mxu1  ;;  %2817 = vst [vmem:[#allocation25_spill] sm:$0xff] %v2362_v33  ;;  %2818 = vst [vmem:[#allocation26_spill] sm:$0xff] %v2365_v34 }
 0x15c   : > { %v1255_v18 = vmax.f32 %v2357_v10, %v1254_v46  ;;  %v591_v28 = vpop.f32.mrb[18].mxu0  ;;  %v1081_v31 = vpop.f32.mrb[18].mxu1  ;;  %vm2772_vm11 = vcmp.lt.s32.totalorder %v2349_v57, 384  ;;  %vm685_vm9 = vcmp.eq.s32.totalorder %v2362_v33, %v2106_v5  ;;  %vm2771_vm12 = vcmp.lt.s32.totalorder %v2365_v34, 384 }
 0x15d   : > { %v700_v40 = vsel %vm683_vm15, %v591_v28, 0.0  ;;  %v2373_v41 = vsel %vm2763_vm6, %v591_v28, -1e+30  ;;  %v1169_v42 = vsel %vm1152_vm14, %v1081_v31, 0.0  ;;  %v2380_v46 = vsel %vm2760_vm0, %v1081_v31, -1e+30 }
 0x15e   : > { %v715_v48 = vadd.f32 %v714_v14, %v700_v40  ;;  %v787_v52 = vmax.f32 %v2373_v41, %v786_v15  ;;  %v1184_v53 = vadd.f32 %v1183_v16, %v1169_v42  ;;  %v1256_v59 = vmax.f32 %v2380_v46, %v1255_v18  ;;  %v593_v2 = vpop.f32.mrb[19].mxu0  ;;  %v1083_v22 = vpop.f32.mrb[19].mxu1 }
 0x15f   : > { %vm2773_vm15 = vcmp.lt.s32.totalorder %v2346_v54, 384  ;;  %vm1153_vm14 = vcmp.eq.s32.totalorder %v2349_v57, %v2106_v5  ;;  %vm665_vm0 = vcmp.lt.s32.totalorder %v2362_v33, 384  ;;  %v634_v14 = vadd.s32 104, %v2086_v63 }
 0x160   : > { %vm1154_vm6 = vcmp.eq.s32.totalorder %v2365_v34, %v2106_v5  ;;  %v2398_v18 = vadd.s32 %v2090_v1, %v633_v38  ;;  %v2401_v29 = vadd.s32 %v2088_v0, %v633_v38  ;;  %v635_v57 = vadd.s32 112, %v2086_v63 }
 0x161   : > { %v596_v15 = vpop.f32.mrb[20].mxu0  ;;  %v1086_v16 = vpop.f32.mrb[20].mxu1  ;;  %v2414_v37 = vadd.s32 %v2090_v1, %v634_v14 }
 0x162   : > { %2819 = vst [vmem:[#allocation27_spill] sm:$0xff] %v2398_v18  ;;  %2820 = vst [vmem:[#allocation28_spill] sm:$0xff] %v2401_v29  ;;  %v701_v28 = vsel %vm684_vm5, %v596_v15, 0.0  ;;  %v2405_v31 = vsel %vm2773_vm15, %v596_v15, -1e+30  ;;  %v1170_v40 = vsel %vm1153_vm14, %v1086_v16, 0.0  ;;  %v2417_v15 = vadd.s32 %v2088_v0, %v634_v14 }
 0x163   : > { %v2409_v42 = vsel %vm2772_vm11, %v1086_v16, -1e+30  ;;  %v716_v2 = vadd.f32 %v715_v48, %v701_v28  ;;  %v788_v22 = vmax.f32 %v2405_v31, %v787_v52  ;;  %v1185_v25 = vadd.f32 %v1184_v53, %v1170_v40  ;;  %v598_v30 = vpop.f32.mrb[21].mxu0  ;;  %v1088_v8 = vpop.f32.mrb[21].mxu1  ;;  %2821 = vst [vmem:[#allocation29_spill] sm:$0xff] %v2414_v37 }
 0x164   : > { %v1257_v56 = vmax.f32 %v2409_v42, %v1256_v59  ;;  %v599_v38 = vpop.f32.mrb[22].mxu0  ;;  %v1089_v49 = vpop.f32.mrb[22].mxu1  ;;  %2822 = vst [vmem:[#allocation30_spill] sm:$0xff] %v2417_v15  ;;  %vm686_vm5 = vcmp.eq.s32.totalorder %v2398_v18, %v2106_v5  ;;  %vm2783_vm14 = vcmp.lt.s32.totalorder %v2401_v29, 384  ;;  %vm687_vm11 = vcmp.eq.s32.totalorder %v2414_v37, %v2106_v5 }
 0x165   : > { %v702_v48 = vsel %vm685_vm9, %v599_v38, 0.0  ;;  %v2425_v52 = vsel %vm665_vm0, %v599_v38, -1e+30  ;;  %v1171_v8 = vsel %vm1154_vm6, %v1089_v49, 0.0  ;;  %v2432_v30 = vsel %vm2771_vm12, %v1089_v49, -1e+30 }
 0x166   : > { %v717_v53 = vadd.f32 %v716_v2, %v702_v48  ;;  %v791_v59 = vmax.f32 %v2425_v52, %v788_v22  ;;  %v1186_v14 = vadd.f32 %v1185_v25, %v1171_v8  ;;  %v1260_v16 = vmax.f32 %v2432_v30, %v1257_v56  ;;  %v601_v28 = vpop.f32.mrb[23].mxu0  ;;  %v1091_v40 = vpop.f32.mrb[23].mxu1 }
 0x167   : > { %vm666_vm9 = vcmp.lt.s32.totalorder %v2398_v18, 384  ;;  %vm1155_vm6 = vcmp.eq.s32.totalorder %v2401_v29, %v2106_v5  ;;  %vm2784_vm12 = vcmp.lt.s32.totalorder %v2414_v37, 384  ;;  %v636_v49 = vadd.s32 120, %v2086_v63 }
 0x168   : > { %vm2782_vm15 = vcmp.lt.s32.totalorder %v2417_v15, 384  ;;  %vm1156_vm3 = vcmp.eq.s32.totalorder %v2417_v15, %v2106_v5  ;;  %v2450_v2 = vadd.s32 %v2090_v1, %v635_v57  ;;  %v2453_v22 = vadd.s32 %v2088_v0, %v635_v57 }
 0x169   : > { %v604_v56 = vpop.f32.mrb[24].mxu0  ;;  %v1094_v25 = vpop.f32.mrb[24].mxu1  ;;  %v2466_v24 = vadd.s32 %v2090_v1, %v636_v49 }
 0x16a   : > { %2823 = vst [vmem:[#allocation31_spill] sm:$0xff] %v2450_v2  ;;  %2824 = vst [vmem:[#allocation32_spill] sm:$0xff] %v2453_v22  ;;  %v703_v38 = vsel %vm686_vm5, %v604_v56, 0.0  ;;  %v2457_v48 = vsel %vm666_vm9, %v604_v56, -1e+30  ;;  %v1172_v8 = vsel %vm1155_vm6, %v1094_v25, 0.0  ;;  %v2469_v56 = vadd.s32 %v2088_v0, %v636_v49 }
 0x16b   : > { %v2461_v28 = vsel %vm2783_vm14, %v1094_v25, -1e+30  ;;  %v718_v40 = vadd.f32 %v717_v53, %v703_v38  ;;  %v789_v34 = vmax.f32 %v2457_v48, %v791_v59  ;;  %v1187_v27 = vadd.f32 %v1186_v14, %v1172_v8  ;;  %v606_v7 = vpop.f32.mrb[25].mxu0  ;;  %v1096_v3 = vpop.f32.mrb[25].mxu1  ;;  %2825 = vst [vmem:[#allocation33_spill] sm:$0xff] %v2466_v24 }
 0x16c   : > { %v1258_v21 = vmax.f32 %v2461_v28, %v1260_v16  ;;  %v607_v57 = vpop.f32.mrb[26].mxu0  ;;  %v1097_v54 = vpop.f32.mrb[26].mxu1  ;;  %2826 = vst [vmem:[#allocation34_spill] sm:$0xff] %v2469_v56  ;;  %vm688_vm5 = vcmp.eq.s32.totalorder %v2450_v2, %v2106_v5  ;;  %vm1141_vm6 = vcmp.lt.s32.totalorder %v2453_v22, 384  ;;  %vm689_vm14 = vcmp.eq.s32.totalorder %v2466_v24, %v2106_v5 }
 0x16d   : > { %v704_v25 = vsel %vm687_vm11, %v607_v57, 0.0  ;;  %v2476_v53 = vsel %vm2784_vm12, %v607_v57, -1e+30  ;;  %v1173_v3 = vsel %vm1156_vm3, %v1097_v54, 0.0  ;;  %v2483_v7 = vsel %vm2782_vm15, %v1097_v54, -1e+30 }
 0x16e   : > { %v719_v1 = vadd.f32 %v718_v40, %v704_v25  ;;  %v790_v0 = vmax.f32 %v2476_v53, %v789_v34  ;;  %v1188_v59 = vadd.f32 %v1187_v27, %v1173_v3  ;;  %v1259_v14 = vmax.f32 %v2483_v7, %v1258_v21  ;;  %v609_v16 = vpop.f32.mrb[27].mxu0  ;;  %v1099_v49 = vpop.f32.mrb[27].mxu1 }
 0x16f   : > { %vm668_vm11 = vcmp.lt.s32.totalorder %v2450_v2, 384  ;;  %vm1157_vm3 = vcmp.eq.s32.totalorder %v2453_v22, %v2106_v5  ;;  %vm669_vm15 = vcmp.lt.s32.totalorder %v2466_v24, 384  ;;  %vm1142_vm12 = vcmp.lt.s32.totalorder %v2469_v56, 384 }
 0x170   : > { %vm1158_vm13 = vcmp.eq.s32.totalorder %v2469_v56, %v2106_v5 }
 0x171   : > { %v612_v54 = vpop.f32.mrb[28].mxu0  ;;  %v1102_v38 = vpop.f32.mrb[28].mxu1 }
 0x172   : > { %v705_v21 = vsel %vm688_vm5, %v612_v54, 0.0  ;;  %v2501_v27 = vsel %vm668_vm11, %v612_v54, -1e+30  ;;  %v1174_v34 = vsel %vm1157_vm3, %v1102_v38, 0.0  ;;  %v2505_v8 = vsel %vm1141_vm6, %v1102_v38, -1e+30 }
 0x173   : > { %v720_v40 = vadd.f32 %v719_v1, %v705_v21  ;;  %v792_v57 = vmax.f32 %v2501_v27, %v790_v0  ;;  %v1189_v25 = vadd.f32 %v1188_v59, %v1174_v34  ;;  %v1261_v3 = vmax.f32 %v2505_v8, %v1259_v14  ;;  %v614_v16 = vpop.f32.mrb[29].mxu0  ;;  %v1104_v49 = vpop.f32.mrb[29].mxu1 }
 0x174   : > { %v615_v15 = vpop.f32.mrb[30].mxu0  ;;  %v1105_v5 = vpop.f32.mrb[30].mxu1 }
 0x175   : > { %v706_v29 = vsel %vm689_vm14, %v615_v15, 0.0  ;;  %v2511_v54 = vsel %vm669_vm15, %v615_v15, -1e+30  ;;  %v1175_v47 = vsel %vm1158_vm13, %v1105_v5, 0.0  ;;  %v2515_v38 = vsel %vm1142_vm12, %v1105_v5, -1e+30 }
 0x176   : > { %v721_v1 = vadd.f32 %v720_v40, %v706_v29  ;;  %v793_v0 = vmax.f32 %v2511_v54, %v792_v57  ;;  %v1190_v59 = vadd.f32 %v1189_v25, %v1175_v47  ;;  %v1262_v14 = vmax.f32 %v2515_v38, %v1261_v3  ;;  %v617_v21 = vpop.f32.mrb[31].mxu0  ;;  %v1107_v34 = vpop.f32.mrb[31].mxu1  ;;  %v690_v47 = vld [vmem:[#allocation4] sm:$0x1]  ;;  %v2519_v25 = vld [vmem:[#allocation2] sm:$0x1] }
 0x177   : > { %v804_v34 = vsub.s32 0, %v2086_v63 }
 0x178   : > { %v722_v16 = vrot.slane %v721_v1, 4  ;;  %v794_v49 = vrot.slane %v793_v0, 4  ;;  %v1191_v22 = vrot.slane %v1190_v59, 4  ;;  %v1263_v37 = vrot.slane %v1262_v14, 4 }
 0x17a   : > { %v723_v2 = vadd.f32 %v722_v16, %v721_v1  ;;  %v795_v24 = vmax.f32 %v793_v0, %v794_v49  ;;  %v1192_v15 = vadd.f32 %v1191_v22, %v1190_v59  ;;  %v1264_v29 = vmax.f32 %v1262_v14, %v1263_v37 }
 0x17c   : > { %v724_v9 = vrot.slane %v723_v2, 2  ;;  %v796_v18 = vrot.slane %v795_v24, 2  ;;  %v1193_v33 = vrot.slane %v1192_v15, 2  ;;  %v1265_v1 = vrot.slane %v1264_v29, 2 }
 0x17e   : > { %v725_v56 = vadd.f32 %v724_v9, %v723_v2  ;;  %v797_v5 = vmax.f32 %v795_v24, %v796_v18  ;;  %v1194_v55 = vadd.f32 %v1193_v33, %v1192_v15  ;;  %v1266_v24 = vmax.f32 %v1264_v29, %v1265_v1 }
 0x180   : > { %v726_v40 = vrot.slane %v725_v56, 1  ;;  %v798_v57 = vrot.slane %v797_v5, 1  ;;  %v1195_v37 = vrot.slane %v1194_v55, 1 }
 0x182   : > { %v727_v3 = vadd.f32 %v726_v40, %v725_v56  ;;  %v799_v21 = vmax.f32 %v797_v5, %v798_v57 }
 0x184   : > { %v728_v0 = vadd.f32 %v727_v3, %v690_v47  ;;  %v2523_v22 = vmax.f32 %v2519_v25, %v799_v21 }
 0x186   : > { %729 = vst [vmem:[#allocation4] sm:$0x1] %v728_v0  ;;  %v2526_v9 = vrot.slane %v2523_v22, %v804_v34  ;;  %899 = vst [vmem:[#allocation2] sm:$0x1] %v2523_v22 }
 0x188   : > { %v807_v18 = vsub.f32 %v2134_v17, %v2526_v9  ;;  %v808_v63 = vsub.f32 %v2146_v23, %v2526_v9  ;;  %v809_v33 = vsub.f32 %v2178_v39, %v2526_v9  ;;  %v810_v2 = vsub.f32 %v2193_v51, %v2526_v9 }
 0x189   : > { %v811_v56 = vsub.f32 %v2236_v12, %v2526_v9  ;;  %v812_v59 = vsub.f32 %v2262_v20, %v2526_v9  ;;  %v813_v14 = vsub.f32 %v2300_v58, %v2526_v9  ;;  %v814_v17 = vsub.f32 %v2322_v32, %v2526_v9 }
 0x18a   : > { %v815_v23 = vsub.f32 %v2353_v62, %v2526_v9  ;;  %v816_v39 = vsub.f32 %v2373_v41, %v2526_v9  ;;  %v817_v51 = vsub.f32 %v2405_v31, %v2526_v9  ;;  %v818_v12 = vsub.f32 %v2425_v52, %v2526_v9 }
 0x18b   : > { %v819_v20 = vsub.f32 %v2457_v48, %v2526_v9  ;;  %v820_v58 = vsub.f32 %v2476_v53, %v2526_v9  ;;  %v821_v32 = vsub.f32 %v2501_v27, %v2526_v9  ;;  %v822_v62 = vsub.f32 %v2511_v54, %v2526_v9 }
 0x18c   : > { %v823_v16 = vmul.f32 1.442695, %v807_v18  ;;  %v825_v41 = vmul.f32 1.442695, %v808_v63  ;;  %v827_v49 = vmul.f32 1.442695, %v809_v33  ;;  %v1196_v48 = vadd.f32 %v1195_v37, %v1194_v55 }
 0x18d   : > { %v829_v15 = vmul.f32 1.442695, %v810_v2  ;;  %v1267_v31 = vrot.slane %v1266_v24, 1  ;;  %v831_v52 = vmul.f32 1.442695, %v811_v56 }
 0x18e   : > { %1694 = vpow2.f32 %v823_v16  ;;  %v833_v5 = vmul.f32 1.442695, %v812_v59  ;;  %v835_v29 = vmul.f32 1.442695, %v813_v14  ;;  %v1159_v53 = vld [vmem:[#allocation4] sm:$0x1] }
 0x18f   : > { %1696 = vpow2.f32 %v825_v41  ;;  %v1268_v40 = vmax.f32 %v1266_v24, %v1267_v31  ;;  %v837_v57 = vmul.f32 1.442695, %v814_v17  ;;  %v1197_v27 = vadd.f32 %v1196_v48, %v1159_v53  ;;  %v2561_v47 = vld [vmem:[#allocation2] sm:$0x1] }
 0x190   : > { %1698 = vpow2.f32 %v827_v49  ;;  %v839_v54 = vmul.f32 1.442695, %v815_v23  ;;  %v841_v21 = vmul.f32 1.442695, %v816_v39  ;;  %v845_v1 = vmul.f32 1.442695, %v818_v12 }
 0x191   : > { %1700 = vpow2.f32 %v829_v15  ;;  %v2564_v3 = vmax.f32 %v2561_v47, %v1268_v40  ;;  %1198 = vst [vmem:[#allocation4] sm:$0x1] %v1197_v27  ;;  %v847_v0 = vmul.f32 1.442695, %v819_v20  ;;  %v849_v9 = vmul.f32 1.442695, %v820_v58 }
 0x192   : > { %1702 = vpow2.f32 %v831_v52  ;;  %v851_v37 = vmul.f32 1.442695, %v821_v32  ;;  %v853_v24 = vmul.f32 1.442695, %v822_v62  ;;  %v843_v4 = vmul.f32 1.442695, %v817_v51 }
 0x193   : > { %1704 = vpow2.f32 %v833_v5  ;;  %v2567_v55 = vrot.slane %v2564_v3, %v804_v34  ;;  %1368 = vst [vmem:[#allocation2] sm:$0x1] %v2564_v3 }
 0x194   : > { %1706 = vpow2.f32 %v835_v29 }
 0x195   : > { %1708 = vpow2.f32 %v837_v57  ;;  %v1276_v18 = vsub.f32 %v2222_v60, %v2567_v55  ;;  %v1277_v63 = vsub.f32 %v2248_v26, %v2567_v55  ;;  %v1278_v33 = vsub.f32 %v2288_v50, %v2567_v55 }
 0x196   : > { %1710 = vpow2.f32 %v839_v54  ;;  %v1279_v34 = vsub.f32 %v2226_v61, %v2567_v55  ;;  %v1280_v56 = vsub.f32 %v2240_v11, %v2567_v55  ;;  %v1281_v59 = vsub.f32 %v2270_v45, %v2567_v55 }
 0x197   : > { %1712 = vpow2.f32 %v841_v21  ;;  %v1282_v26 = vsub.f32 %v2304_v35, %v2567_v55  ;;  %v1283_v50 = vsub.f32 %v2330_v44, %v2567_v55  ;;  %v1284_v11 = vsub.f32 %v2357_v10, %v2567_v55 }
 0x198   : > { %v1695_v2 = vpop.eup %1694  ;;  %1714 = vpow2.f32 %v845_v1  ;;  %v1285_v45 = vsub.f32 %v2380_v46, %v2567_v55  ;;  %v1286_v35 = vsub.f32 %v2409_v42, %v2567_v55  ;;  %v1287_v6 = vsub.f32 %v2432_v30, %v2567_v55 }
 0x199   : > { %v1697_v14 = vpop.eup %1696  ;;  %v855_v60 = vsel %vm654_vm2, %v1695_v2, 0.0  ;;  %1716 = vpow2.f32 %v847_v0  ;;  %v1288_v10 = vsub.f32 %v2461_v28, %v2567_v55  ;;  %v1289_v51 = vsub.f32 %v2483_v7, %v2567_v55  ;;  %v2831_v2 = vld [vmem:[#allocation17_spill] sm:$0xff] }
 0x19a   : > { %v1699_v17 = vpop.eup %1698  ;;  %v856_v61 = vsel %vm655_vm4, %v1697_v14, 0.0  ;;  %1718 = vpow2.f32 %v849_v9  ;;  %vm2827_vm2 = vcmp.lt.s32.totalorder %v2137_v19, 384  ;;  %v1290_v13 = vsub.f32 %v2505_v8, %v2567_v55 }
 0x19b   : > { %v1701_v23 = vpop.eup %1700  ;;  %v876_v39 = vadd.f32 %v856_v61, %v855_v60  ;;  %1720 = vpow2.f32 %v851_v37  ;;  %v857_v44 = vsel %vm656_vm7, %v1699_v17, 0.0  ;;  %v1291_v62 = vsub.f32 %v2515_v38, %v2567_v55  ;;  %v2855_v61 = vld [vmem:[#allocation16_spill] sm:$0xff] }
 0x19c   : > { %v1703_v12 = vpop.eup %1702  ;;  %1722 = vpow2.f32 %v853_v24  ;;  %v858_v32 = vsel %vm2827_vm2, %v1701_v23, 0.0  ;;  %v1292_v49 = vmul.f32 1.442695, %v1276_v18  ;;  %v1294_v15 = vmul.f32 1.442695, %v1277_v63 }
 0x19d   : > { %v877_v20 = vadd.f32 %v876_v39, %v857_v44  ;;  %v1705_v58 = vpop.eup %1704  ;;  %1724 = vpow2.f32 %v843_v4  ;;  %v859_v52 = vsel %vm658_vm1, %v1703_v12, 0.0  ;;  %v1296_v5 = vmul.f32 1.442695, %v1278_v33 }
 0x19e   : > { %v1707_v16 = vpop.eup %1706  ;;  %v1298_v48 = vmul.f32 1.442695, %v1279_v34  ;;  %1726 = vpow2.f32 %v1292_v49  ;;  %v860_v40 = vsel %vm659_vm8, %v1705_v58, 0.0  ;;  %v1300_v57 = vmul.f32 1.442695, %v1280_v56  ;;  %v2833_v56 = vld [vmem:[#allocation29_spill] sm:$0xff] }
 0x19f   : > { %v878_v41 = vadd.f32 %v877_v20, %v858_v32  ;;  %v1709_v31 = vpop.eup %1708  ;;  %1728 = vpow2.f32 %v1294_v15  ;;  %v861_v0 = vsel %vm660_vm10, %v1707_v16, 0.0  ;;  %v1302_v37 = vmul.f32 1.442695, %v1281_v59  ;;  %v2836_v59 = vld [vmem:[#allocation19_spill] sm:$0xff]  ;;  %v2839_v16 = vld [vmem:[#allocation21_spill] sm:$0xff] }
 0x1a0   : > { %v1711_v29 = vpop.eup %1710  ;;  %1730 = vpow2.f32 %v1296_v5  ;;  %vm2832_vm4 = vcmp.lt.s32.totalorder %v2831_v2, 384  ;;  %vm2834_vm7 = vcmp.lt.s32.totalorder %v2833_v56, 384  ;;  %v1304_v60 = vmul.f32 1.442695, %v1282_v26  ;;  %v2853_v56 = vld [vmem:[#allocation14_spill] sm:$0xff] }
 0x1a1   : > { %v879_v19 = vadd.f32 %v878_v41, %v859_v52  ;;  %v1713_v53 = vpop.eup %1712  ;;  %1732 = vpow2.f32 %v1298_v48  ;;  %v862_v34 = vsel %vm2832_vm4, %v1709_v31, 0.0  ;;  %vm2837_vm10 = vcmp.lt.s32.totalorder %v2836_v59, 384  ;;  %v2841_v52 = vld [vmem:[#allocation23_spill] sm:$0xff] }
 0x1a2   : > { %v1715_v27 = vpop.eup %1714  ;;  %1734 = vpow2.f32 %v1300_v57  ;;  %v863_v39 = vsel %vm2837_vm10, %v1711_v29, 0.0  ;;  %v1306_v20 = vmul.f32 1.442695, %v1283_v50  ;;  %v1308_v26 = vmul.f32 1.442695, %v1284_v11  ;;  %v2843_v29 = vld [vmem:[#allocation9_spill] sm:$0xff] }
 0x1a3   : > { %v880_v54 = vadd.f32 %v879_v19, %v860_v40  ;;  %v1717_v21 = vpop.eup %1716  ;;  %v866_v9 = vsel %vm665_vm0, %v1715_v27, 0.0  ;;  %1736 = vpow2.f32 %v1302_v37  ;;  %vm2840_vm0 = vcmp.lt.s32.totalorder %v2839_v16, 384  ;;  %v2845_v11 = vld [vmem:[#allocation10_spill] sm:$0xff] }
 0x1a4   : > { %v1719_v24 = vpop.eup %1718  ;;  %v867_v63 = vsel %vm666_vm9, %v1717_v21, 0.0  ;;  %v864_v41 = vsel %vm2840_vm0, %v1713_v53, 0.0  ;;  %1738 = vpow2.f32 %v1304_v60  ;;  %vm2842_vm1 = vcmp.lt.s32.totalorder %v2841_v52, 384 }
 0x1a5   : > { %v881_v43 = vadd.f32 %v880_v54, %v861_v0  ;;  %v1721_v33 = vpop.eup %1720  ;;  %v868_v14 = vsel %vm2834_vm7, %v1719_v24, 0.0  ;;  %1740 = vpow2.f32 %v1306_v20  ;;  %v1310_v48 = vmul.f32 1.442695, %v1285_v45  ;;  %v2847_v45 = vld [vmem:[#allocation11_spill] sm:$0xff]  ;;  %v2849_v24 = vld [vmem:[#allocation12_spill] sm:$0xff] }
 0x1a6   : > { %v1723_v17 = vpop.eup %1722  ;;  %v869_v23 = vsel %vm668_vm11, %v1721_v33, 0.0  ;;  %vm2844_vm8 = vcmp.lt.s32.totalorder %v2843_v29, 384  ;;  %v872_v53 = vsub.f32 %v2519_v25, %v2523_v22  ;;  %vm2846_vm13 = vcmp.lt.s32.totalorder %v2845_v11, 384  ;;  %v2851_v33 = vld [vmem:[#allocation13_spill] sm:$0xff] }
 0x1a7   : > { %v882_v4 = vadd.f32 %v881_v43, %v862_v34  ;;  %v870_v12 = vsel %vm669_vm15, %v1723_v17, 0.0  ;;  %v1725_v58 = vpop.eup %1724  ;;  %1742 = vpow2.f32 %v1308_v26  ;;  %v1312_v54 = vmul.f32 1.442695, %v1286_v35  ;;  %v2861_v26 = vld [vmem:[#allocation22_spill] sm:$0xff] }
 0x1a8   : > { %v1727_v49 = vpop.eup %1726  ;;  %v865_v5 = vsel %vm2842_vm1, %v1725_v58, 0.0  ;;  %vm2848_vm15 = vcmp.lt.s32.totalorder %v2847_v45, 384  ;;  %1744 = vpow2.f32 %v1310_v48  ;;  %v1314_v25 = vmul.f32 1.442695, %v1287_v6  ;;  %v2859_v58 = vld [vmem:[#allocation20_spill] sm:$0xff] }
 0x1a9   : > { %v883_v32 = vadd.f32 %v882_v4, %v863_v39  ;;  %v1729_v31 = vpop.eup %1728  ;;  %v1324_v50 = vsel %vm2844_vm8, %v1727_v49, 0.0  ;;  %v873_v36 = vmul.f32 1.442695, %v872_v53  ;;  %vm2850_vm9 = vcmp.lt.s32.totalorder %v2849_v24, 384  ;;  %v2857_v39 = vld [vmem:[#allocation18_spill] sm:$0xff] }
 0x1aa   : > { %v1731_v19 = vpop.eup %1730  ;;  %v1325_v57 = vsel %vm2846_vm13, %v1729_v31, 0.0  ;;  %1746 = vpow2.f32 %v1312_v54  ;;  %v1316_v42 = vmul.f32 1.442695, %v1288_v10  ;;  %vm2852_vm14 = vcmp.lt.s32.totalorder %v2851_v33, 384  ;;  %v2863_v31 = vld [vmem:[#allocation24_spill] sm:$0xff] }
 0x1ab   : > { %v884_v15 = vadd.f32 %v883_v32, %v864_v41  ;;  %v1733_v27 = vpop.eup %1732  ;;  %v1345_v21 = vadd.f32 %v1325_v57, %v1324_v50  ;;  %v1326_v1 = vsel %vm2848_vm15, %v1731_v19, 0.0  ;;  %1748 = vpow2.f32 %v1314_v25  ;;  %v871_v48 = vld [vmem:[#allocation3] sm:$0x1] }
 0x1ac   : > { %v1735_v0 = vpop.eup %1734  ;;  %v1327_v18 = vsel %vm2850_vm9, %v1733_v27, 0.0  ;;  %v1318_v30 = vmul.f32 1.442695, %v1289_v51  ;;  %1750 = vpow2.f32 %v873_v36  ;;  %vm2854_vm11 = vcmp.lt.s32.totalorder %v2853_v56, 384  ;;  %v2865_v19 = vld [vmem:[#allocation26_spill] sm:$0xff] }
 0x1ad   : > { %v885_v40 = vadd.f32 %v884_v15, %v865_v5  ;;  %v1346_v22 = vadd.f32 %v1345_v21, %v1326_v1  ;;  %v1737_v43 = vpop.eup %1736  ;;  %v1328_v2 = vsel %vm2852_vm14, %v1735_v0, 0.0  ;;  %1752 = vpow2.f32 %v1316_v42  ;;  %v2867_v21 = vld [vmem:[#allocation28_spill] sm:$0xff]  ;;  %v2869_v25 = vld [vmem:[#allocation30_spill] sm:$0xff] }
 0x1ae   : > { %v1739_v34 = vpop.eup %1738  ;;  %v1329_v60 = vsel %vm2854_vm11, %v1737_v43, 0.0  ;;  %v1320_v28 = vmul.f32 1.442695, %v1290_v13  ;;  %vm2856_vm5 = vcmp.lt.s32.totalorder %v2855_v61, 384  ;;  %1754 = vpow2.f32 %v1318_v30 }
 0x1af   : > { %v886_v46 = vadd.f32 %v885_v40, %v866_v9  ;;  %v1347_v35 = vadd.f32 %v1346_v22, %v1327_v18  ;;  %v1741_v17 = vpop.eup %1740  ;;  %v1330_v4 = vsel %vm2856_vm5, %v1739_v34, 0.0  ;;  %v1322_v7 = vmul.f32 1.442695, %v1291_v62 }
 0x1b0   : > { %vm2858_vm3 = vcmp.lt.s32.totalorder %v2857_v39, 384  ;;  %1756 = vpow2.f32 %v1320_v28  ;;  %vm2860_vm2 = vcmp.lt.s32.totalorder %v2859_v58, 384  ;;  %vm2862_vm4 = vcmp.lt.s32.totalorder %v2861_v26, 384 }
 0x1b1   : > { %v887_v37 = vadd.f32 %v886_v46, %v867_v63  ;;  %v1348_v6 = vadd.f32 %v1347_v35, %v1328_v2  ;;  %v1743_v59 = vpop.eup %1742  ;;  %v1331_v44 = vsel %vm2858_vm3, %v1741_v17, 0.0  ;;  %1758 = vpow2.f32 %v1322_v7 }
 0x1b2   : > { %v1745_v20 = vpop.eup %1744  ;;  %vm2864_vm7 = vcmp.lt.s32.totalorder %v2863_v31, 384  ;;  %vm2866_vm10 = vcmp.lt.s32.totalorder %v2865_v19, 384  ;;  %v1341_v40 = vsub.f32 %v2561_v47, %v2564_v3  ;;  %vm2868_vm0 = vcmp.lt.s32.totalorder %v2867_v21, 384 }
 0x1b3   : > { %v888_v9 = vadd.f32 %v887_v37, %v868_v14  ;;  %v1349_v10 = vadd.f32 %v1348_v6, %v1329_v60  ;;  %v1333_v38 = vsel %vm2862_vm4, %v1745_v20, 0.0  ;;  %vm2870_vm1 = vcmp.lt.s32.totalorder %v2869_v25, 384 }
 0x1b4   : > { %v1747_v32 = vpop.eup %1746  ;;  %v1342_v36 = vmul.f32 1.442695, %v1341_v40 }
 0x1b5   : > { %v889_v63 = vadd.f32 %v888_v9, %v869_v23  ;;  %v1350_v51 = vadd.f32 %v1349_v10, %v1330_v4  ;;  %v1749_v55 = vpop.eup %1748  ;;  %v1334_v52 = vsel %vm2864_vm7, %v1747_v32, 0.0  ;;  %v1373_v4 = vld [vmem:[#allocation4] sm:$0x1] (!%p1556_p4) }
 0x1b6   : > { %v1751_v49 = vpop.eup %1750  ;;  %v1335_v53 = vsel %vm2866_vm10, %v1749_v55, 0.0  ;;  %1760 = vpow2.f32 %v1342_v36 }
 0x1b7   : > { %v890_v14 = vadd.f32 %v889_v63, %v870_v12  ;;  %v1351_v8 = vadd.f32 %v1350_v51, %v1331_v44  ;;  %v1332_v12 = vsel %vm2860_vm2, %v1743_v59, 0.0  ;;  %v1753_v5 = vpop.eup %1752  ;;  %v875_v27 = vmul.f32 %v1751_v49, %v871_v48 }
 0x1b8   : > { %v1755_v11 = vpop.eup %1754  ;;  %v1336_v46 = vsel %vm2868_vm0, %v1753_v5, 0.0 }
 0x1b9   : > { %v891_v23 = vrot.slane %v890_v14, 4  ;;  %v1352_v16 = vadd.f32 %v1351_v8, %v1332_v12  ;;  %v1337_v22 = vsel %vm2870_vm1, %v1755_v11, 0.0 }
 0x1ba   : > { %v1757_v45 = vpop.eup %1756 }
 0x1bb   : > { %v892_v13 = vadd.f32 %v891_v23, %v890_v14  ;;  %v1353_v62 = vadd.f32 %v1352_v16, %v1333_v38  ;;  %v1759_v37 = vpop.eup %1758  ;;  %v1338_v47 = vsel %vm1141_vm6, %v1757_v45, 0.0  ;;  %v1374_v14 = vld [vmem:[#allocation2] sm:$0x1] (!%p1556_p4) }
 0x1bc   : > { %v1339_v42 = vsel %vm1142_vm12, %v1759_v37, 0.0 }
 0x1bd   : > { %v893_v41 = vrot.slane %v892_v13, 2  ;;  %v1354_v29 = vadd.f32 %v1353_v62, %v1334_v52 }
 0x1bf   : > { %v894_v15 = vadd.f32 %v893_v41, %v892_v13  ;;  %v1355_v57 = vadd.f32 %v1354_v29, %v1335_v53 }
 0x1c0   : > { %v1761_v6 = vpop.eup %1760 }
 0x1c1   : > { %v895_v50 = vrot.slane %v894_v15, 1  ;;  %v1356_v1 = vadd.f32 %v1355_v57, %v1336_v46 }
 0x1c3   : > { %v896_v54 = vadd.f32 %v895_v50, %v894_v15  ;;  %v1357_v24 = vadd.f32 %v1356_v1, %v1337_v22 }
 0x1c5   : > { %v897_v0 = vadd.f32 %v896_v54, %v875_v27  ;;  %v1358_v3 = vadd.f32 %v1357_v24, %v1338_v47 }
 0x1c7   : > { %898 = vst [vmem:[#allocation3] sm:$0x1] %v897_v0  ;;  %v1359_v35 = vadd.f32 %v1358_v3, %v1339_v42 }
 0x1c9   : > { %v1360_v9 = vrot.slane %v1359_v35, 4 }
 0x1cb   : > { %v1361_v33 = vadd.f32 %v1360_v9, %v1359_v35 }
 0x1cd   : > { %v1362_v2 = vrot.slane %v1361_v33, 2 }
 0x1ce   : > { %v1340_v34 = vld [vmem:[#allocation3] sm:$0x1] }
 0x1cf   : > { %v1363_v30 = vadd.f32 %v1362_v2, %v1361_v33  ;;  %v1344_v63 = vmul.f32 %v1761_v6, %v1340_v34 }
 0x1d1   : > { %v1364_v56 = vrot.slane %v1363_v30, 1  ;;  %1372 = sbr.rel (%p1556_p4) target bundleno = 497 (0x1f1), region = 81 }
 0x1d3   : > { %v1365_v60 = vadd.f32 %v1364_v56, %v1363_v30 }
 0x1d5   : > { %v1366_v17 = vadd.f32 %v1365_v60, %v1344_v63 }
 0x1d7   : > { %1367 = vst [vmem:[#allocation3] sm:$0x1] %v1366_v17 }
 0x1de   : > { %v1375_v28 = vld [vmem:[#allocation3] sm:$0x1] }
 0x1df   : > { %1762 = vlog2.f32 %v1375_v28 }
 0x1e9   : > { %v1763_v10 = vpop.eup %1762 }
 0x1ea   : > { %v1377_v61 = vmul.f32 0.6931472, %v1763_v10 }
 0x1ec   : > { %v1378_v59 = vadd.f32 %v1377_v61, %v1374_v14 }
 0x1ee   : > { %v1379_v7 = vsub.f32 %v1373_v4, %v1378_v59 }
 0x1f0   : > { %1380 = vst [vmem:[%s317_s8] sm:$0x1] %v1379_v7 }
 0x1f1 PF: > { %s1557_s21 = sshll.u32 %s1846_s16, 4  ;;  %s1394_s30 = sshll.u32 %s317_s8, 4  ;;  %s1395_s30 = int_to_ptr.vmem [resolvable:$true] %s1394_s30 }
 0x1f2   : > { %s2698_s28 = scalar_lea.hbm %s2751_s3, %s1557_s21  ;;  %s1382_s4 = scalar_lea.sflag [#allocation7], %s2007_s10 }
 0x1f3   : > { %s1764_s5 = scalar_lea.vmem %s1395_s30, 16  ;;  %s1863_s6 = smov [#allocation6]  }
 0x1f4   : > { %p1765_p5 = scmp.ne.s32.totalorder %s1395_s30, %s1764_s5  ;;  %s1768_s7 = sshll.u32 %s1863_s6, 4  ;;  %s1769_s7 = int_to_ptr.vmem [resolvable:$false] %s1768_s7 }
 0x1f5   : > { %s1770_s9 = scalar_lea.vmem %s1769_s7, 32  ;;  %p1771_p10 = scmp.lt.s32.totalorder %s1395_s30, %s1769_s7 }
 0x1f6   : > { %p1766_p6 = pnand %p1765_p5, %p1940_p7  ;;  %p1772_p11 = scmp.lt.s32.totalorder %s1770_s9, %s1764_s5 }
 0x1f8   : > { %p1767_p8 = pneg %p1766_p6  ;;  %p1773_p12 = por %p1772_p11, %p1771_p10 }
 0x1fa   : > { %p1774_p13 = pnand %p1773_p12, %p1767_p8 }
 0x1fc   : > { %1777 = shalt.err (!%p1774_p13)
}
 0x1fd   : > { %s1778_s16 = scalar_lea.hbm %s2698_s28, 16  ;;  %s1782_s11 = scalar_lea.hbm %s2751_s3, 32 }
 0x1fe   : > { %p1779_p0 = scmp.ne.s32.totalorder %s2698_s28, %s1778_s16  ;;  %p1783_p3 = scmp.lt.u32.totalorder %s2698_s28, %s2751_s3 }
 0x1ff   : > { %p1784_p4 = scmp.lt.u32.totalorder %s1782_s11, %s1778_s16  ;;  %p1786_p6 = scmp.lt.u32.totalorder %s1778_s16, %s2698_s28 }
 0x200   : > { %p1780_p1 = pnand %p1779_p0, %p1940_p7 }
 0x201   : > { %p1785_p5 = por %p1784_p4, %p1783_p3 }
 0x202   : > { %p1781_p2 = pneg %p1780_p1 }
 0x203   : > { %p1787_p8 = por %p1786_p6, %p1785_p5 }
 0x205   : > { %p1788_p10 = pnand %p1787_p8, %p1781_p2 }
 0x207   : > { %1791 = shalt.err (!%p1788_p10)
}
 0x208   : > { %1563 = dma.vmem_to_hbm [thread:$0]  (%p1940_p7), %s1395_s30, 16, %s2698_s28, %s1382_s4  }
 0x209 PF: > { %p1569_p11 = scmp.ge.s32.totalorder %s1858_s19, 2  ;;  %s1406_s21 = sand.u32 1, %s1830_s12  }
 0x20a   : > { %s1407_s27 = scalar_lea.sflag [#allocation7], %s1406_s21 }
 0x20b   : > { %p1566_p12 = pnand %p1569_p11, %p1946_p9 }
 0x20d   : > { %1825 = dma.done.wait (!%p1566_p12), %s1407_s27, 16  }
 0x20e   : > { %1827 = vsyncadd (!%p1566_p12), %s1407_s27, 4294967280  ;;  %s16_s19 = sadd.s32 1, %s1858_s19   ;;  %s2873_s12 = smov %s1834_s13 }
 0x20f   : > { %p13_p13 = scmp.ge.s32.totalorder %s16_s19, 6   ;;  %s2874_s13 = smov %s1838_s14 }
 0x210   : > { %s2875_s14 = smov %s1954_s29  ;;  %s2876_s15 = smov %s1850_s17 }
 0x211   : > { %s2877_s16 = smov %s1854_s18  ;;  %s2878_s17 = smov %s2881_s22 }
 0x212   : > { %s2879_s18 = smov %s2885_s23  ;;  %15 = sbr.rel (!%p13_p13) target bundleno = 5 (0x5), region = 127 }
 0x219   :  { %1411 = vsyncpa [#allocation7], 1 }
 0x21a   :  { %1413 = vsyncpa [#allocation7 + $0x1], 1 }

</bundles_post_ra>
